<compile_context>
chip_gen: v7x
topology: tpu7x:2x2x1
jax: 0.10.0
libtpu: 0.0.40
codegen_flags: <defaults>
</compile_context>

<pallas_src>
import functools

import jax
import jax.numpy as jnp
from jax import lax
from jax.experimental import pallas as pl
from jax.experimental.pallas import tpu as pltpu


# ---------------------------------------------------------------------------
# Pallas kernel: GroupNorm -> (x*(scale+1)+shift) -> SiLU -> Conv1d(k=7, pad=3)
# ---------------------------------------------------------------------------
def _block_kernel(*refs, tb, c_in, length, groups, ks, eps, kc_pad, has_ss):
    if has_ss:
        (x_ref, gamma_ref, beta_ref, scale_ref, shift_ref,
         w_ref, bias_ref, o_ref) = refs
    else:
        x_ref, gamma_ref, beta_ref, w_ref, bias_ref, o_ref = refs
        scale_ref = shift_ref = None

    cg = c_in // groups
    half = ks // 2
    n_lanes = tb * length
    inv_n = 1.0 / float(cg * length)

    x = x_ref[...].astype(jnp.float32)            # (C_in, TB*L)
    gamma = gamma_ref[...].astype(jnp.float32)    # (C_in, 1)
    beta = beta_ref[...].astype(jnp.float32)      # (C_in, 1)

    # ---- GroupNorm stats (VPU/XLU only) + fold norm/affine/FiLM into one FMA ----
    xn_chunks = []
    for t in range(tb):                            # compile-time unrolled (tb small)
        xt = x[:, t * length:(t + 1) * length]     # lane-aligned static chunk (C_in, L)
        rs = jnp.sum(xt, axis=1, keepdims=True)    # per-channel sums (C_in, 1)
        rq = jnp.sum(xt * xt, axis=1, keepdims=True)

        if has_ss:
            sc_t = scale_ref[t].astype(jnp.float32) + 1.0   # (C_in, 1)
            sh_t = shift_ref[t].astype(jnp.float32)

        a_parts, b_parts = [], []
        for g in range(groups):                    # group math on tiny (cg,1)/(1,1) slices
            lo, hi = g * cg, (g + 1) * cg
            gs = jnp.sum(rs[lo:hi], axis=0, keepdims=True)   # (1, 1)
            gq = jnp.sum(rq[lo:hi], axis=0, keepdims=True)   # (1, 1)
            mean_g = gs * inv_n
            var_g = gq * inv_n - mean_g * mean_g
            rstd_g = lax.rsqrt(var_g + eps)

            a_g = rstd_g * gamma[lo:hi]                      # (cg, 1)
            b_g = beta[lo:hi] - mean_g * a_g
            if has_ss:
                a_g = a_g * sc_t[lo:hi]
                b_g = b_g * sc_t[lo:hi] + sh_t[lo:hi]
            a_parts.append(a_g)
            b_parts.append(b_g)

        a_t = jnp.concatenate(a_parts, axis=0)     # (C_in, 1)
        b_t = jnp.concatenate(b_parts, axis=0)     # (C_in, 1)
        xn_chunks.append(xt * a_t + b_t)           # single FMA over the (C_in, L) chunk

    xn = xn_chunks[0] if tb == 1 else jnp.concatenate(xn_chunks, axis=1)  # (C_in, TB*L)

    # ---- SiLU (sigmoid on the EUP) ----
    act = xn * jax.nn.sigmoid(xn)

    # ---- Conv1d(k=ks, pad=ks//2) as one bf16 im2col matmul; taps via lane roll ----
    pos = lax.broadcasted_iota(jnp.int32, (1, n_lanes), 1) % length   # pos within sample
    rows = []
    for k in range(ks):
        d = k - half                               # tap offset: needs act[:, l + d]
        if d == 0:
            sh_k = act
        else:
            rolled = pltpu.roll(act, shift=(-d) % n_lanes, axis=1)
            valid = (pos < length - d) if d > 0 else (pos >= -d)
            sh_k = jnp.where(valid, rolled, 0.0)   # zero the out-of-sample taps
        rows.append(sh_k.astype(jnp.bfloat16))     # rows ordered k*C_in + ci
    if kc_pad > ks * c_in:                         # zero rows matching padded weight
        rows.append(jnp.zeros((kc_pad - ks * c_in, n_lanes), jnp.bfloat16))
    cols = jnp.concatenate(rows, axis=0)           # (kc_pad, TB*L) bf16

    y = jnp.dot(w_ref[...], cols, preferred_element_type=jnp.float32)  # (C_out, TB*L)
    y = y + bias_ref[...].astype(jnp.float32)
    o_ref[...] = y.astype(o_ref.dtype)


def block_forward(x, gamma, beta, w, bias, scale_shift=None, *, groups=8, eps=1e-5):
    """x: (B, C_in, L). Returns (B, C_out, L). Matches PyTorch Block.forward."""
    b, c_in, length = x.shape
    c_out, _, ks = w.shape
    has_ss = scale_shift is not None

    # several samples per grid step: amortizes per-step overhead, matmul N = TB*L
    tb = min(b, 8)
    while b % tb:
        tb -= 1
    nb = b // tb

    # lane-dense activation slab (C_in, B*L) — layout plumbing done by XLA
    x2 = jnp.transpose(x, (1, 0, 2)).reshape(c_in, b * length)

    # conv weight (C_out, C_in, ks) -> (C_out, ks*C_in), rows k*C_in + ci,
    # contraction zero-padded to a 128-multiple, pre-cast to bf16 for the MXU.
    kc = ks * c_in
    kc_pad = ((kc + 127) // 128) * 128
    w2 = jnp.transpose(w, (0, 2, 1)).reshape(c_out, kc)
    w2 = jnp.pad(w2, ((0, 0), (0, kc_pad - kc))).astype(jnp.bfloat16)

    gamma2 = gamma.reshape(c_in, 1).astype(jnp.float32)
    beta2 = beta.reshape(c_in, 1).astype(jnp.float32)
    bias2 = bias.reshape(c_out, 1).astype(jnp.float32)

    kernel = functools.partial(
        _block_kernel, tb=tb, c_in=c_in, length=length, groups=groups,
        ks=ks, eps=eps, kc_pad=kc_pad, has_ss=has_ss)

    in_specs = [
        pl.BlockSpec((c_in, tb * length), lambda i: (0, i)),   # x slab
        pl.BlockSpec((c_in, 1), lambda i: (0, 0)),             # gamma
        pl.BlockSpec((c_in, 1), lambda i: (0, 0)),             # beta
    ]
    args = [x2, gamma2, beta2]
    if has_ss:
        scale, shift = scale_shift
        in_specs += [
            pl.BlockSpec((tb, c_in, 1), lambda i: (i, 0, 0)),  # scale
            pl.BlockSpec((tb, c_in, 1), lambda i: (i, 0, 0)),  # shift
        ]
        args += [scale, shift]
    in_specs += [
        pl.BlockSpec((c_out, kc_pad), lambda i: (0, 0)),       # conv weight (bf16)
        pl.BlockSpec((c_out, 1), lambda i: (0, 0)),            # conv bias
    ]
    args += [w2, bias2]

    out2 = pl.pallas_call(
        kernel,
        out_shape=jax.ShapeDtypeStruct((c_out, b * length), x.dtype),
        grid_spec=pltpu.PrefetchScalarGridSpec(
            num_scalar_prefetch=0,
            grid=(nb,),
            in_specs=in_specs,
            out_specs=pl.BlockSpec((c_out, tb * length), lambda i: (0, i)),
        ),
        compiler_params=pltpu.CompilerParams(dimension_semantics=("parallel",)),
    )(*args)

    # TODO(synk): for production-size (C, L) on v7x (64 MiB VMEM) add an L-tiling
    # grid axis (also feeds both TensorCores) instead of the full-L im2col buffer.
    return jnp.transpose(out2.reshape(c_out, b, length), (1, 0, 2))


# ---------------------------------------------------------------------------
# Pure-JAX reference (for correctness check)
# ---------------------------------------------------------------------------
def block_reference(x, gamma, beta, w, bias, scale_shift=None, *, groups=8, eps=1e-5):
    b, c, l = x.shape
    cg = c // groups
    xr = x.reshape(b, groups, cg * l)
    mean = xr.mean(-1, keepdims=True)
    var = ((xr - mean) ** 2).mean(-1, keepdims=True)
    xn = ((xr - mean) * lax.rsqrt(var + eps)).reshape(b, c, l)
    xn = xn * gamma[None, :, None] + beta[None, :, None]
    if scale_shift is not None:
        scale, shift = scale_shift
        xn = xn * (scale + 1.0) + shift
    act = xn * jax.nn.sigmoid(xn)
    y = lax.conv_general_dilated(act, w, window_strides=(1,), padding=[(3, 3)],
                                 dimension_numbers=("NCH", "OIH", "NCH"))
    return y + bias[None, :, None]


if __name__ == "__main__":
    key = jax.random.PRNGKey(0)
    k_x, k_w, k_b, k_sc, k_sh = jax.random.split(key, 5)

    B, C_IN, C_OUT, L, GROUPS, KS = 2, 16, 32, 128, 8, 7

    x = jax.random.normal(k_x, (B, C_IN, L), jnp.float32)
    # GroupNorm affine params (PyTorch default init: gamma=1, beta=0)
    gamma = jnp.ones((C_IN,), jnp.float32)
    beta = jnp.zeros((C_IN,), jnp.float32)
    # Conv1d parameters (deterministic random init)
    w = jax.random.normal(k_w, (C_OUT, C_IN, KS), jnp.float32) * 0.05
    bias = jax.random.normal(k_b, (C_OUT,), jnp.float32) * 0.05
    # scale_shift (as produced by e.g. a time embedding), each (B, C_IN, 1)
    scale = jax.random.normal(k_sc, (B, C_IN, 1), jnp.float32) * 0.1
    shift = jax.random.normal(k_sh, (B, C_IN, 1), jnp.float32) * 0.1

    # path with FiLM scale/shift
    out = block_forward(x, gamma, beta, w, bias, scale_shift=(scale, shift), groups=GROUPS)
    out = jax.block_until_ready(out)
    ref = block_reference(x, gamma, beta, w, bias, scale_shift=(scale, shift), groups=GROUPS)
    assert out.shape == (B, C_OUT, L)
    # bf16 conv matmul (f32 accumulation) -> relaxed tolerance
    assert jnp.max(jnp.abs(out - ref)) < 5e-2, "mismatch vs reference (scale_shift)"

    # specialized path without scale_shift
    out0 = block_forward(x, gamma, beta, w, bias, scale_shift=None, groups=GROUPS)
    out0 = jax.block_until_ready(out0)
    ref0 = block_reference(x, gamma, beta, w, bias, scale_shift=None, groups=GROUPS)
    assert jnp.max(jnp.abs(out0 - ref0)) < 5e-2, "mismatch vs reference (no scale_shift)"

    print("KERNEL_OK")
</pallas_src>

<mosaic_0001>
module attributes {stable_mosaic.version = 11 : i64} {
  func.func @_block_kernel(%arg0: i32, %arg1: memref<16x256xf32, #tpu.memory_space<vmem>>, %arg2: memref<16x1xf32, #tpu.memory_space<vmem>>, %arg3: memref<16x1xf32, #tpu.memory_space<vmem>>, %arg4: memref<2x16x1xf32, #tpu.memory_space<vmem>>, %arg5: memref<2x16x1xf32, #tpu.memory_space<vmem>>, %arg6: memref<32x128xbf16, #tpu.memory_space<vmem>>, %arg7: memref<32x1xf32, #tpu.memory_space<vmem>>, %arg8: memref<32x256xf32, #tpu.memory_space<vmem>>) attributes {dimension_semantics = [#tpu.dimension_semantics<parallel>], iteration_bounds = array<i64: 1>, scalar_prefetch = 0 : i64, scratch_operands = 0 : i64, tpu.core_type = #tpu.core_type<tc>, window_params = [{transform_indices = @transform_0, window_bounds = array<i64: 16, 256>}, {pipeline_mode = #tpu.pipeline_mode<synchronous>, transform_indices = @transform_1, window_bounds = array<i64: 16, 1>}, {pipeline_mode = #tpu.pipeline_mode<synchronous>, transform_indices = @transform_2, window_bounds = array<i64: 16, 1>}, {transform_indices = @transform_3, window_bounds = array<i64: 2, 16, 1>}, {transform_indices = @transform_4, window_bounds = array<i64: 2, 16, 1>}, {pipeline_mode = #tpu.pipeline_mode<synchronous>, transform_indices = @transform_5, window_bounds = array<i64: 32, 128>}, {pipeline_mode = #tpu.pipeline_mode<synchronous>, transform_indices = @transform_6, window_bounds = array<i64: 32, 1>}, {transform_indices = @transform_7, window_bounds = array<i64: 32, 256>}]} {
    %c0 = arith.constant 0 : index
    %c0_0 = arith.constant 0 : index
    %0 = vector.load %arg1[%c0, %c0_0] : memref<16x256xf32, #tpu.memory_space<vmem>>, vector<16x256xf32>
    %c0_1 = arith.constant 0 : index
    %c0_2 = arith.constant 0 : index
    %1 = vector.load %arg2[%c0_1, %c0_2] : memref<16x1xf32, #tpu.memory_space<vmem>>, vector<16x1xf32>
    %c0_3 = arith.constant 0 : index
    %c0_4 = arith.constant 0 : index
    %2 = vector.load %arg3[%c0_3, %c0_4] : memref<16x1xf32, #tpu.memory_space<vmem>>, vector<16x1xf32>
    %3 = vector.extract_strided_slice %0 {offsets = [0, 0], sizes = [16, 128], strides = [1, 1]} : vector<16x256xf32> to vector<16x128xf32>
    %cst = arith.constant dense<0.000000e+00> : vector<16xf32>
    %4 = vector.multi_reduction <add>, %3, %cst [1] : vector<16x128xf32> to vector<16xf32>
    %5 = vector.shape_cast %4 : vector<16xf32> to vector<16x1xf32>
    %6 = arith.mulf %3, %3 : vector<16x128xf32>
    %cst_5 = arith.constant dense<0.000000e+00> : vector<16xf32>
    %7 = vector.multi_reduction <add>, %6, %cst_5 [1] : vector<16x128xf32> to vector<16xf32>
    %8 = vector.shape_cast %7 : vector<16xf32> to vector<16x1xf32>
    %c0_6 = arith.constant 0 : index
    %c0_7 = arith.constant 0 : index
    %c0_8 = arith.constant 0 : index
    %9 = vector.load %arg4[%c0_6, %c0_7, %c0_8] : memref<2x16x1xf32, #tpu.memory_space<vmem>>, vector<1x16x1xf32>
    %10 = vector.shape_cast %9 : vector<1x16x1xf32> to vector<16x1xf32>
    %cst_9 = arith.constant 1.000000e+00 : f32
    %11 = vector.broadcast %cst_9 : f32 to vector<16x1xf32>
    %12 = arith.addf %10, %11 : vector<16x1xf32>
    %c0_10 = arith.constant 0 : index
    %c0_11 = arith.constant 0 : index
    %c0_12 = arith.constant 0 : index
    %13 = vector.load %arg5[%c0_10, %c0_11, %c0_12] : memref<2x16x1xf32, #tpu.memory_space<vmem>>, vector<1x16x1xf32>
    %14 = vector.shape_cast %13 : vector<1x16x1xf32> to vector<16x1xf32>
    %15 = vector.extract_strided_slice %5 {offsets = [0, 0], sizes = [2, 1], strides = [1, 1]} : vector<16x1xf32> to vector<2x1xf32>
    %cst_13 = arith.constant dense<0.000000e+00> : vector<1xf32>
    %16 = vector.multi_reduction <add>, %15, %cst_13 [0] : vector<2x1xf32> to vector<1xf32>
    %17 = vector.shape_cast %16 : vector<1xf32> to vector<1x1xf32>
    %18 = vector.extract_strided_slice %8 {offsets = [0, 0], sizes = [2, 1], strides = [1, 1]} : vector<16x1xf32> to vector<2x1xf32>
    %cst_14 = arith.constant dense<0.000000e+00> : vector<1xf32>
    %19 = vector.multi_reduction <add>, %18, %cst_14 [0] : vector<2x1xf32> to vector<1xf32>
    %20 = vector.shape_cast %19 : vector<1xf32> to vector<1x1xf32>
    %cst_15 = arith.constant 3.906250e-03 : f32
    %21 = vector.broadcast %cst_15 : f32 to vector<1x1xf32>
    %22 = arith.mulf %17, %21 : vector<1x1xf32>
    %cst_16 = arith.constant 3.906250e-03 : f32
    %23 = vector.broadcast %cst_16 : f32 to vector<1x1xf32>
    %24 = arith.mulf %20, %23 : vector<1x1xf32>
    %25 = arith.mulf %22, %22 : vector<1x1xf32>
    %26 = arith.subf %24, %25 : vector<1x1xf32>
    %cst_17 = arith.constant 9.99999974E-6 : f32
    %27 = vector.broadcast %cst_17 : f32 to vector<1x1xf32>
    %28 = arith.addf %26, %27 : vector<1x1xf32>
    %29 = math.rsqrt %28 : vector<1x1xf32>
    %30 = vector.extract_strided_slice %1 {offsets = [0, 0], sizes = [2, 1], strides = [1, 1]} : vector<16x1xf32> to vector<2x1xf32>
    %31 = vector.broadcast %29 : vector<1x1xf32> to vector<2x1xf32>
    %32 = arith.mulf %31, %30 : vector<2x1xf32>
    %33 = vector.extract_strided_slice %2 {offsets = [0, 0], sizes = [2, 1], strides = [1, 1]} : vector<16x1xf32> to vector<2x1xf32>
    %34 = vector.broadcast %22 : vector<1x1xf32> to vector<2x1xf32>
    %35 = arith.mulf %34, %32 : vector<2x1xf32>
    %36 = arith.subf %33, %35 : vector<2x1xf32>
    %37 = vector.extract_strided_slice %12 {offsets = [0, 0], sizes = [2, 1], strides = [1, 1]} : vector<16x1xf32> to vector<2x1xf32>
    %38 = arith.mulf %32, %37 : vector<2x1xf32>
    %39 = vector.extract_strided_slice %12 {offsets = [0, 0], sizes = [2, 1], strides = [1, 1]} : vector<16x1xf32> to vector<2x1xf32>
    %40 = arith.mulf %36, %39 : vector<2x1xf32>
    %41 = vector.extract_strided_slice %14 {offsets = [0, 0], sizes = [2, 1], strides = [1, 1]} : vector<16x1xf32> to vector<2x1xf32>
    %42 = arith.addf %40, %41 : vector<2x1xf32>
    %43 = vector.extract_strided_slice %5 {offsets = [2, 0], sizes = [2, 1], strides = [1, 1]} : vector<16x1xf32> to vector<2x1xf32>
    %cst_18 = arith.constant dense<0.000000e+00> : vector<1xf32>
    %44 = vector.multi_reduction <add>, %43, %cst_18 [0] : vector<2x1xf32> to vector<1xf32>
    %45 = vector.shape_cast %44 : vector<1xf32> to vector<1x1xf32>
    %46 = vector.extract_strided_slice %8 {offsets = [2, 0], sizes = [2, 1], strides = [1, 1]} : vector<16x1xf32> to vector<2x1xf32>
    %cst_19 = arith.constant dense<0.000000e+00> : vector<1xf32>
    %47 = vector.multi_reduction <add>, %46, %cst_19 [0] : vector<2x1xf32> to vector<1xf32>
    %48 = vector.shape_cast %47 : vector<1xf32> to vector<1x1xf32>
    %cst_20 = arith.constant 3.906250e-03 : f32
    %49 = vector.broadcast %cst_20 : f32 to vector<1x1xf32>
    %50 = arith.mulf %45, %49 : vector<1x1xf32>
    %cst_21 = arith.constant 3.906250e-03 : f32
    %51 = vector.broadcast %cst_21 : f32 to vector<1x1xf32>
    %52 = arith.mulf %48, %51 : vector<1x1xf32>
    %53 = arith.mulf %50, %50 : vector<1x1xf32>
    %54 = arith.subf %52, %53 : vector<1x1xf32>
    %cst_22 = arith.constant 9.99999974E-6 : f32
    %55 = vector.broadcast %cst_22 : f32 to vector<1x1xf32>
    %56 = arith.addf %54, %55 : vector<1x1xf32>
    %57 = math.rsqrt %56 : vector<1x1xf32>
    %58 = vector.extract_strided_slice %1 {offsets = [2, 0], sizes = [2, 1], strides = [1, 1]} : vector<16x1xf32> to vector<2x1xf32>
    %59 = vector.broadcast %57 : vector<1x1xf32> to vector<2x1xf32>
    %60 = arith.mulf %59, %58 : vector<2x1xf32>
    %61 = vector.extract_strided_slice %2 {offsets = [2, 0], sizes = [2, 1], strides = [1, 1]} : vector<16x1xf32> to vector<2x1xf32>
    %62 = vector.broadcast %50 : vector<1x1xf32> to vector<2x1xf32>
    %63 = arith.mulf %62, %60 : vector<2x1xf32>
    %64 = arith.subf %61, %63 : vector<2x1xf32>
    %65 = vector.extract_strided_slice %12 {offsets = [2, 0], sizes = [2, 1], strides = [1, 1]} : vector<16x1xf32> to vector<2x1xf32>
    %66 = arith.mulf %60, %65 : vector<2x1xf32>
    %67 = vector.extract_strided_slice %12 {offsets = [2, 0], sizes = [2, 1], strides = [1, 1]} : vector<16x1xf32> to vector<2x1xf32>
    %68 = arith.mulf %64, %67 : vector<2x1xf32>
    %69 = vector.extract_strided_slice %14 {offsets = [2, 0], sizes = [2, 1], strides = [1, 1]} : vector<16x1xf32> to vector<2x1xf32>
    %70 = arith.addf %68, %69 : vector<2x1xf32>
    %71 = vector.extract_strided_slice %5 {offsets = [4, 0], sizes = [2, 1], strides = [1, 1]} : vector<16x1xf32> to vector<2x1xf32>
    %cst_23 = arith.constant dense<0.000000e+00> : vector<1xf32>
    %72 = vector.multi_reduction <add>, %71, %cst_23 [0] : vector<2x1xf32> to vector<1xf32>
    %73 = vector.shape_cast %72 : vector<1xf32> to vector<1x1xf32>
    %74 = vector.extract_strided_slice %8 {offsets = [4, 0], sizes = [2, 1], strides = [1, 1]} : vector<16x1xf32> to vector<2x1xf32>
    %cst_24 = arith.constant dense<0.000000e+00> : vector<1xf32>
    %75 = vector.multi_reduction <add>, %74, %cst_24 [0] : vector<2x1xf32> to vector<1xf32>
    %76 = vector.shape_cast %75 : vector<1xf32> to vector<1x1xf32>
    %cst_25 = arith.constant 3.906250e-03 : f32
    %77 = vector.broadcast %cst_25 : f32 to vector<1x1xf32>
    %78 = arith.mulf %73, %77 : vector<1x1xf32>
    %cst_26 = arith.constant 3.906250e-03 : f32
    %79 = vector.broadcast %cst_26 : f32 to vector<1x1xf32>
    %80 = arith.mulf %76, %79 : vector<1x1xf32>
    %81 = arith.mulf %78, %78 : vector<1x1xf32>
    %82 = arith.subf %80, %81 : vector<1x1xf32>
    %cst_27 = arith.constant 9.99999974E-6 : f32
    %83 = vector.broadcast %cst_27 : f32 to vector<1x1xf32>
    %84 = arith.addf %82, %83 : vector<1x1xf32>
    %85 = math.rsqrt %84 : vector<1x1xf32>
    %86 = vector.extract_strided_slice %1 {offsets = [4, 0], sizes = [2, 1], strides = [1, 1]} : vector<16x1xf32> to vector<2x1xf32>
    %87 = vector.broadcast %85 : vector<1x1xf32> to vector<2x1xf32>
    %88 = arith.mulf %87, %86 : vector<2x1xf32>
    %89 = vector.extract_strided_slice %2 {offsets = [4, 0], sizes = [2, 1], strides = [1, 1]} : vector<16x1xf32> to vector<2x1xf32>
    %90 = vector.broadcast %78 : vector<1x1xf32> to vector<2x1xf32>
    %91 = arith.mulf %90, %88 : vector<2x1xf32>
    %92 = arith.subf %89, %91 : vector<2x1xf32>
    %93 = vector.extract_strided_slice %12 {offsets = [4, 0], sizes = [2, 1], strides = [1, 1]} : vector<16x1xf32> to vector<2x1xf32>
    %94 = arith.mulf %88, %93 : vector<2x1xf32>
    %95 = vector.extract_strided_slice %12 {offsets = [4, 0], sizes = [2, 1], strides = [1, 1]} : vector<16x1xf32> to vector<2x1xf32>
    %96 = arith.mulf %92, %95 : vector<2x1xf32>
    %97 = vector.extract_strided_slice %14 {offsets = [4, 0], sizes = [2, 1], strides = [1, 1]} : vector<16x1xf32> to vector<2x1xf32>
    %98 = arith.addf %96, %97 : vector<2x1xf32>
    %99 = vector.extract_strided_slice %5 {offsets = [6, 0], sizes = [2, 1], strides = [1, 1]} : vector<16x1xf32> to vector<2x1xf32>
    %cst_28 = arith.constant dense<0.000000e+00> : vector<1xf32>
    %100 = vector.multi_reduction <add>, %99, %cst_28 [0] : vector<2x1xf32> to vector<1xf32>
    %101 = vector.shape_cast %100 : vector<1xf32> to vector<1x1xf32>
    %102 = vector.extract_strided_slice %8 {offsets = [6, 0], sizes = [2, 1], strides = [1, 1]} : vector<16x1xf32> to vector<2x1xf32>
    %cst_29 = arith.constant dense<0.000000e+00> : vector<1xf32>
    %103 = vector.multi_reduction <add>, %102, %cst_29 [0] : vector<2x1xf32> to vector<1xf32>
    %104 = vector.shape_cast %103 : vector<1xf32> to vector<1x1xf32>
    %cst_30 = arith.constant 3.906250e-03 : f32
    %105 = vector.broadcast %cst_30 : f32 to vector<1x1xf32>
    %106 = arith.mulf %101, %105 : vector<1x1xf32>
    %cst_31 = arith.constant 3.906250e-03 : f32
    %107 = vector.broadcast %cst_31 : f32 to vector<1x1xf32>
    %108 = arith.mulf %104, %107 : vector<1x1xf32>
    %109 = arith.mulf %106, %106 : vector<1x1xf32>
    %110 = arith.subf %108, %109 : vector<1x1xf32>
    %cst_32 = arith.constant 9.99999974E-6 : f32
    %111 = vector.broadcast %cst_32 : f32 to vector<1x1xf32>
    %112 = arith.addf %110, %111 : vector<1x1xf32>
    %113 = math.rsqrt %112 : vector<1x1xf32>
    %114 = vector.extract_strided_slice %1 {offsets = [6, 0], sizes = [2, 1], strides = [1, 1]} : vector<16x1xf32> to vector<2x1xf32>
    %115 = vector.broadcast %113 : vector<1x1xf32> to vector<2x1xf32>
    %116 = arith.mulf %115, %114 : vector<2x1xf32>
    %117 = vector.extract_strided_slice %2 {offsets = [6, 0], sizes = [2, 1], strides = [1, 1]} : vector<16x1xf32> to vector<2x1xf32>
    %118 = vector.broadcast %106 : vector<1x1xf32> to vector<2x1xf32>
    %119 = arith.mulf %118, %116 : vector<2x1xf32>
    %120 = arith.subf %117, %119 : vector<2x1xf32>
    %121 = vector.extract_strided_slice %12 {offsets = [6, 0], sizes = [2, 1], strides = [1, 1]} : vector<16x1xf32> to vector<2x1xf32>
    %122 = arith.mulf %116, %121 : vector<2x1xf32>
    %123 = vector.extract_strided_slice %12 {offsets = [6, 0], sizes = [2, 1], strides = [1, 1]} : vector<16x1xf32> to vector<2x1xf32>
    %124 = arith.mulf %120, %123 : vector<2x1xf32>
    %125 = vector.extract_strided_slice %14 {offsets = [6, 0], sizes = [2, 1], strides = [1, 1]} : vector<16x1xf32> to vector<2x1xf32>
    %126 = arith.addf %124, %125 : vector<2x1xf32>
    %127 = vector.extract_strided_slice %5 {offsets = [8, 0], sizes = [2, 1], strides = [1, 1]} : vector<16x1xf32> to vector<2x1xf32>
    %cst_33 = arith.constant dense<0.000000e+00> : vector<1xf32>
    %128 = vector.multi_reduction <add>, %127, %cst_33 [0] : vector<2x1xf32> to vector<1xf32>
    %129 = vector.shape_cast %128 : vector<1xf32> to vector<1x1xf32>
    %130 = vector.extract_strided_slice %8 {offsets = [8, 0], sizes = [2, 1], strides = [1, 1]} : vector<16x1xf32> to vector<2x1xf32>
    %cst_34 = arith.constant dense<0.000000e+00> : vector<1xf32>
    %131 = vector.multi_reduction <add>, %130, %cst_34 [0] : vector<2x1xf32> to vector<1xf32>
    %132 = vector.shape_cast %131 : vector<1xf32> to vector<1x1xf32>
    %cst_35 = arith.constant 3.906250e-03 : f32
    %133 = vector.broadcast %cst_35 : f32 to vector<1x1xf32>
    %134 = arith.mulf %129, %133 : vector<1x1xf32>
    %cst_36 = arith.constant 3.906250e-03 : f32
    %135 = vector.broadcast %cst_36 : f32 to vector<1x1xf32>
    %136 = arith.mulf %132, %135 : vector<1x1xf32>
    %137 = arith.mulf %134, %134 : vector<1x1xf32>
    %138 = arith.subf %136, %137 : vector<1x1xf32>
    %cst_37 = arith.constant 9.99999974E-6 : f32
    %139 = vector.broadcast %cst_37 : f32 to vector<1x1xf32>
    %140 = arith.addf %138, %139 : vector<1x1xf32>
    %141 = math.rsqrt %140 : vector<1x1xf32>
    %142 = vector.extract_strided_slice %1 {offsets = [8, 0], sizes = [2, 1], strides = [1, 1]} : vector<16x1xf32> to vector<2x1xf32>
    %143 = vector.broadcast %141 : vector<1x1xf32> to vector<2x1xf32>
    %144 = arith.mulf %143, %142 : vector<2x1xf32>
    %145 = vector.extract_strided_slice %2 {offsets = [8, 0], sizes = [2, 1], strides = [1, 1]} : vector<16x1xf32> to vector<2x1xf32>
    %146 = vector.broadcast %134 : vector<1x1xf32> to vector<2x1xf32>
    %147 = arith.mulf %146, %144 : vector<2x1xf32>
    %148 = arith.subf %145, %147 : vector<2x1xf32>
    %149 = vector.extract_strided_slice %12 {offsets = [8, 0], sizes = [2, 1], strides = [1, 1]} : vector<16x1xf32> to vector<2x1xf32>
    %150 = arith.mulf %144, %149 : vector<2x1xf32>
    %151 = vector.extract_strided_slice %12 {offsets = [8, 0], sizes = [2, 1], strides = [1, 1]} : vector<16x1xf32> to vector<2x1xf32>
    %152 = arith.mulf %148, %151 : vector<2x1xf32>
    %153 = vector.extract_strided_slice %14 {offsets = [8, 0], sizes = [2, 1], strides = [1, 1]} : vector<16x1xf32> to vector<2x1xf32>
    %154 = arith.addf %152, %153 : vector<2x1xf32>
    %155 = vector.extract_strided_slice %5 {offsets = [10, 0], sizes = [2, 1], strides = [1, 1]} : vector<16x1xf32> to vector<2x1xf32>
    %cst_38 = arith.constant dense<0.000000e+00> : vector<1xf32>
    %156 = vector.multi_reduction <add>, %155, %cst_38 [0] : vector<2x1xf32> to vector<1xf32>
    %157 = vector.shape_cast %156 : vector<1xf32> to vector<1x1xf32>
    %158 = vector.extract_strided_slice %8 {offsets = [10, 0], sizes = [2, 1], strides = [1, 1]} : vector<16x1xf32> to vector<2x1xf32>
    %cst_39 = arith.constant dense<0.000000e+00> : vector<1xf32>
    %159 = vector.multi_reduction <add>, %158, %cst_39 [0] : vector<2x1xf32> to vector<1xf32>
    %160 = vector.shape_cast %159 : vector<1xf32> to vector<1x1xf32>
    %cst_40 = arith.constant 3.906250e-03 : f32
    %161 = vector.broadcast %cst_40 : f32 to vector<1x1xf32>
    %162 = arith.mulf %157, %161 : vector<1x1xf32>
    %cst_41 = arith.constant 3.906250e-03 : f32
    %163 = vector.broadcast %cst_41 : f32 to vector<1x1xf32>
    %164 = arith.mulf %160, %163 : vector<1x1xf32>
    %165 = arith.mulf %162, %162 : vector<1x1xf32>
    %166 = arith.subf %164, %165 : vector<1x1xf32>
    %cst_42 = arith.constant 9.99999974E-6 : f32
    %167 = vector.broadcast %cst_42 : f32 to vector<1x1xf32>
    %168 = arith.addf %166, %167 : vector<1x1xf32>
    %169 = math.rsqrt %168 : vector<1x1xf32>
    %170 = vector.extract_strided_slice %1 {offsets = [10, 0], sizes = [2, 1], strides = [1, 1]} : vector<16x1xf32> to vector<2x1xf32>
    %171 = vector.broadcast %169 : vector<1x1xf32> to vector<2x1xf32>
    %172 = arith.mulf %171, %170 : vector<2x1xf32>
    %173 = vector.extract_strided_slice %2 {offsets = [10, 0], sizes = [2, 1], strides = [1, 1]} : vector<16x1xf32> to vector<2x1xf32>
    %174 = vector.broadcast %162 : vector<1x1xf32> to vector<2x1xf32>
    %175 = arith.mulf %174, %172 : vector<2x1xf32>
    %176 = arith.subf %173, %175 : vector<2x1xf32>
    %177 = vector.extract_strided_slice %12 {offsets = [10, 0], sizes = [2, 1], strides = [1, 1]} : vector<16x1xf32> to vector<2x1xf32>
    %178 = arith.mulf %172, %177 : vector<2x1xf32>
    %179 = vector.extract_strided_slice %12 {offsets = [10, 0], sizes = [2, 1], strides = [1, 1]} : vector<16x1xf32> to vector<2x1xf32>
    %180 = arith.mulf %176, %179 : vector<2x1xf32>
    %181 = vector.extract_strided_slice %14 {offsets = [10, 0], sizes = [2, 1], strides = [1, 1]} : vector<16x1xf32> to vector<2x1xf32>
    %182 = arith.addf %180, %181 : vector<2x1xf32>
    %183 = vector.extract_strided_slice %5 {offsets = [12, 0], sizes = [2, 1], strides = [1, 1]} : vector<16x1xf32> to vector<2x1xf32>
    %cst_43 = arith.constant dense<0.000000e+00> : vector<1xf32>
    %184 = vector.multi_reduction <add>, %183, %cst_43 [0] : vector<2x1xf32> to vector<1xf32>
    %185 = vector.shape_cast %184 : vector<1xf32> to vector<1x1xf32>
    %186 = vector.extract_strided_slice %8 {offsets = [12, 0], sizes = [2, 1], strides = [1, 1]} : vector<16x1xf32> to vector<2x1xf32>
    %cst_44 = arith.constant dense<0.000000e+00> : vector<1xf32>
    %187 = vector.multi_reduction <add>, %186, %cst_44 [0] : vector<2x1xf32> to vector<1xf32>
    %188 = vector.shape_cast %187 : vector<1xf32> to vector<1x1xf32>
    %cst_45 = arith.constant 3.906250e-03 : f32
    %189 = vector.broadcast %cst_45 : f32 to vector<1x1xf32>
    %190 = arith.mulf %185, %189 : vector<1x1xf32>
    %cst_46 = arith.constant 3.906250e-03 : f32
    %191 = vector.broadcast %cst_46 : f32 to vector<1x1xf32>
    %192 = arith.mulf %188, %191 : vector<1x1xf32>
    %193 = arith.mulf %190, %190 : vector<1x1xf32>
    %194 = arith.subf %192, %193 : vector<1x1xf32>
    %cst_47 = arith.constant 9.99999974E-6 : f32
    %195 = vector.broadcast %cst_47 : f32 to vector<1x1xf32>
    %196 = arith.addf %194, %195 : vector<1x1xf32>
    %197 = math.rsqrt %196 : vector<1x1xf32>
    %198 = vector.extract_strided_slice %1 {offsets = [12, 0], sizes = [2, 1], strides = [1, 1]} : vector<16x1xf32> to vector<2x1xf32>
    %199 = vector.broadcast %197 : vector<1x1xf32> to vector<2x1xf32>
    %200 = arith.mulf %199, %198 : vector<2x1xf32>
    %201 = vector.extract_strided_slice %2 {offsets = [12, 0], sizes = [2, 1], strides = [1, 1]} : vector<16x1xf32> to vector<2x1xf32>
    %202 = vector.broadcast %190 : vector<1x1xf32> to vector<2x1xf32>
    %203 = arith.mulf %202, %200 : vector<2x1xf32>
    %204 = arith.subf %201, %203 : vector<2x1xf32>
    %205 = vector.extract_strided_slice %12 {offsets = [12, 0], sizes = [2, 1], strides = [1, 1]} : vector<16x1xf32> to vector<2x1xf32>
    %206 = arith.mulf %200, %205 : vector<2x1xf32>
    %207 = vector.extract_strided_slice %12 {offsets = [12, 0], sizes = [2, 1], strides = [1, 1]} : vector<16x1xf32> to vector<2x1xf32>
    %208 = arith.mulf %204, %207 : vector<2x1xf32>
    %209 = vector.extract_strided_slice %14 {offsets = [12, 0], sizes = [2, 1], strides = [1, 1]} : vector<16x1xf32> to vector<2x1xf32>
    %210 = arith.addf %208, %209 : vector<2x1xf32>
    %211 = vector.extract_strided_slice %5 {offsets = [14, 0], sizes = [2, 1], strides = [1, 1]} : vector<16x1xf32> to vector<2x1xf32>
    %cst_48 = arith.constant dense<0.000000e+00> : vector<1xf32>
    %212 = vector.multi_reduction <add>, %211, %cst_48 [0] : vector<2x1xf32> to vector<1xf32>
    %213 = vector.shape_cast %212 : vector<1xf32> to vector<1x1xf32>
    %214 = vector.extract_strided_slice %8 {offsets = [14, 0], sizes = [2, 1], strides = [1, 1]} : vector<16x1xf32> to vector<2x1xf32>
    %cst_49 = arith.constant dense<0.000000e+00> : vector<1xf32>
    %215 = vector.multi_reduction <add>, %214, %cst_49 [0] : vector<2x1xf32> to vector<1xf32>
    %216 = vector.shape_cast %215 : vector<1xf32> to vector<1x1xf32>
    %cst_50 = arith.constant 3.906250e-03 : f32
    %217 = vector.broadcast %cst_50 : f32 to vector<1x1xf32>
    %218 = arith.mulf %213, %217 : vector<1x1xf32>
    %cst_51 = arith.constant 3.906250e-03 : f32
    %219 = vector.broadcast %cst_51 : f32 to vector<1x1xf32>
    %220 = arith.mulf %216, %219 : vector<1x1xf32>
    %221 = arith.mulf %218, %218 : vector<1x1xf32>
    %222 = arith.subf %220, %221 : vector<1x1xf32>
    %cst_52 = arith.constant 9.99999974E-6 : f32
    %223 = vector.broadcast %cst_52 : f32 to vector<1x1xf32>
    %224 = arith.addf %222, %223 : vector<1x1xf32>
    %225 = math.rsqrt %224 : vector<1x1xf32>
    %226 = vector.extract_strided_slice %1 {offsets = [14, 0], sizes = [2, 1], strides = [1, 1]} : vector<16x1xf32> to vector<2x1xf32>
    %227 = vector.broadcast %225 : vector<1x1xf32> to vector<2x1xf32>
    %228 = arith.mulf %227, %226 : vector<2x1xf32>
    %229 = vector.extract_strided_slice %2 {offsets = [14, 0], sizes = [2, 1], strides = [1, 1]} : vector<16x1xf32> to vector<2x1xf32>
    %230 = vector.broadcast %218 : vector<1x1xf32> to vector<2x1xf32>
    %231 = arith.mulf %230, %228 : vector<2x1xf32>
    %232 = arith.subf %229, %231 : vector<2x1xf32>
    %233 = vector.extract_strided_slice %12 {offsets = [14, 0], sizes = [2, 1], strides = [1, 1]} : vector<16x1xf32> to vector<2x1xf32>
    %234 = arith.mulf %228, %233 : vector<2x1xf32>
    %235 = vector.extract_strided_slice %12 {offsets = [14, 0], sizes = [2, 1], strides = [1, 1]} : vector<16x1xf32> to vector<2x1xf32>
    %236 = arith.mulf %232, %235 : vector<2x1xf32>
    %237 = vector.extract_strided_slice %14 {offsets = [14, 0], sizes = [2, 1], strides = [1, 1]} : vector<16x1xf32> to vector<2x1xf32>
    %238 = arith.addf %236, %237 : vector<2x1xf32>
    %239 = tpu.concatenate %38, %66, %94, %122, %150, %178, %206, %234 in 0 : vector<2x1xf32>, vector<2x1xf32>, vector<2x1xf32>, vector<2x1xf32>, vector<2x1xf32>, vector<2x1xf32>, vector<2x1xf32>, vector<2x1xf32> -> vector<16x1xf32>
    %240 = tpu.concatenate %42, %70, %98, %126, %154, %182, %210, %238 in 0 : vector<2x1xf32>, vector<2x1xf32>, vector<2x1xf32>, vector<2x1xf32>, vector<2x1xf32>, vector<2x1xf32>, vector<2x1xf32>, vector<2x1xf32> -> vector<16x1xf32>
    %241 = vector.broadcast %239 : vector<16x1xf32> to vector<16x128xf32>
    %242 = arith.mulf %3, %241 : vector<16x128xf32>
    %243 = vector.broadcast %240 : vector<16x1xf32> to vector<16x128xf32>
    %244 = arith.addf %242, %243 : vector<16x128xf32>
    %245 = vector.extract_strided_slice %0 {offsets = [0, 128], sizes = [16, 128], strides = [1, 1]} : vector<16x256xf32> to vector<16x128xf32>
    %cst_53 = arith.constant dense<0.000000e+00> : vector<16xf32>
    %246 = vector.multi_reduction <add>, %245, %cst_53 [1] : vector<16x128xf32> to vector<16xf32>
    %247 = vector.shape_cast %246 : vector<16xf32> to vector<16x1xf32>
    %248 = arith.mulf %245, %245 : vector<16x128xf32>
    %cst_54 = arith.constant dense<0.000000e+00> : vector<16xf32>
    %249 = vector.multi_reduction <add>, %248, %cst_54 [1] : vector<16x128xf32> to vector<16xf32>
    %250 = vector.shape_cast %249 : vector<16xf32> to vector<16x1xf32>
    %c1 = arith.constant 1 : index
    %c0_55 = arith.constant 0 : index
    %c0_56 = arith.constant 0 : index
    %251 = vector.load %arg4[%c1, %c0_55, %c0_56] : memref<2x16x1xf32, #tpu.memory_space<vmem>>, vector<1x16x1xf32>
    %252 = vector.shape_cast %251 : vector<1x16x1xf32> to vector<16x1xf32>
    %cst_57 = arith.constant 1.000000e+00 : f32
    %253 = vector.broadcast %cst_57 : f32 to vector<16x1xf32>
    %254 = arith.addf %252, %253 : vector<16x1xf32>
    %c1_58 = arith.constant 1 : index
    %c0_59 = arith.constant 0 : index
    %c0_60 = arith.constant 0 : index
    %255 = vector.load %arg5[%c1_58, %c0_59, %c0_60] : memref<2x16x1xf32, #tpu.memory_space<vmem>>, vector<1x16x1xf32>
    %256 = vector.shape_cast %255 : vector<1x16x1xf32> to vector<16x1xf32>
    %257 = vector.extract_strided_slice %247 {offsets = [0, 0], sizes = [2, 1], strides = [1, 1]} : vector<16x1xf32> to vector<2x1xf32>
    %cst_61 = arith.constant dense<0.000000e+00> : vector<1xf32>
    %258 = vector.multi_reduction <add>, %257, %cst_61 [0] : vector<2x1xf32> to vector<1xf32>
    %259 = vector.shape_cast %258 : vector<1xf32> to vector<1x1xf32>
    %260 = vector.extract_strided_slice %250 {offsets = [0, 0], sizes = [2, 1], strides = [1, 1]} : vector<16x1xf32> to vector<2x1xf32>
    %cst_62 = arith.constant dense<0.000000e+00> : vector<1xf32>
    %261 = vector.multi_reduction <add>, %260, %cst_62 [0] : vector<2x1xf32> to vector<1xf32>
    %262 = vector.shape_cast %261 : vector<1xf32> to vector<1x1xf32>
    %cst_63 = arith.constant 3.906250e-03 : f32
    %263 = vector.broadcast %cst_63 : f32 to vector<1x1xf32>
    %264 = arith.mulf %259, %263 : vector<1x1xf32>
    %cst_64 = arith.constant 3.906250e-03 : f32
    %265 = vector.broadcast %cst_64 : f32 to vector<1x1xf32>
    %266 = arith.mulf %262, %265 : vector<1x1xf32>
    %267 = arith.mulf %264, %264 : vector<1x1xf32>
    %268 = arith.subf %266, %267 : vector<1x1xf32>
    %cst_65 = arith.constant 9.99999974E-6 : f32
    %269 = vector.broadcast %cst_65 : f32 to vector<1x1xf32>
    %270 = arith.addf %268, %269 : vector<1x1xf32>
    %271 = math.rsqrt %270 : vector<1x1xf32>
    %272 = vector.extract_strided_slice %1 {offsets = [0, 0], sizes = [2, 1], strides = [1, 1]} : vector<16x1xf32> to vector<2x1xf32>
    %273 = vector.broadcast %271 : vector<1x1xf32> to vector<2x1xf32>
    %274 = arith.mulf %273, %272 : vector<2x1xf32>
    %275 = vector.extract_strided_slice %2 {offsets = [0, 0], sizes = [2, 1], strides = [1, 1]} : vector<16x1xf32> to vector<2x1xf32>
    %276 = vector.broadcast %264 : vector<1x1xf32> to vector<2x1xf32>
    %277 = arith.mulf %276, %274 : vector<2x1xf32>
    %278 = arith.subf %275, %277 : vector<2x1xf32>
    %279 = vector.extract_strided_slice %254 {offsets = [0, 0], sizes = [2, 1], strides = [1, 1]} : vector<16x1xf32> to vector<2x1xf32>
    %280 = arith.mulf %274, %279 : vector<2x1xf32>
    %281 = vector.extract_strided_slice %254 {offsets = [0, 0], sizes = [2, 1], strides = [1, 1]} : vector<16x1xf32> to vector<2x1xf32>
    %282 = arith.mulf %278, %281 : vector<2x1xf32>
    %283 = vector.extract_strided_slice %256 {offsets = [0, 0], sizes = [2, 1], strides = [1, 1]} : vector<16x1xf32> to vector<2x1xf32>
    %284 = arith.addf %282, %283 : vector<2x1xf32>
    %285 = vector.extract_strided_slice %247 {offsets = [2, 0], sizes = [2, 1], strides = [1, 1]} : vector<16x1xf32> to vector<2x1xf32>
    %cst_66 = arith.constant dense<0.000000e+00> : vector<1xf32>
    %286 = vector.multi_reduction <add>, %285, %cst_66 [0] : vector<2x1xf32> to vector<1xf32>
    %287 = vector.shape_cast %286 : vector<1xf32> to vector<1x1xf32>
    %288 = vector.extract_strided_slice %250 {offsets = [2, 0], sizes = [2, 1], strides = [1, 1]} : vector<16x1xf32> to vector<2x1xf32>
    %cst_67 = arith.constant dense<0.000000e+00> : vector<1xf32>
    %289 = vector.multi_reduction <add>, %288, %cst_67 [0] : vector<2x1xf32> to vector<1xf32>
    %290 = vector.shape_cast %289 : vector<1xf32> to vector<1x1xf32>
    %cst_68 = arith.constant 3.906250e-03 : f32
    %291 = vector.broadcast %cst_68 : f32 to vector<1x1xf32>
    %292 = arith.mulf %287, %291 : vector<1x1xf32>
    %cst_69 = arith.constant 3.906250e-03 : f32
    %293 = vector.broadcast %cst_69 : f32 to vector<1x1xf32>
    %294 = arith.mulf %290, %293 : vector<1x1xf32>
    %295 = arith.mulf %292, %292 : vector<1x1xf32>
    %296 = arith.subf %294, %295 : vector<1x1xf32>
    %cst_70 = arith.constant 9.99999974E-6 : f32
    %297 = vector.broadcast %cst_70 : f32 to vector<1x1xf32>
    %298 = arith.addf %296, %297 : vector<1x1xf32>
    %299 = math.rsqrt %298 : vector<1x1xf32>
    %300 = vector.extract_strided_slice %1 {offsets = [2, 0], sizes = [2, 1], strides = [1, 1]} : vector<16x1xf32> to vector<2x1xf32>
    %301 = vector.broadcast %299 : vector<1x1xf32> to vector<2x1xf32>
    %302 = arith.mulf %301, %300 : vector<2x1xf32>
    %303 = vector.extract_strided_slice %2 {offsets = [2, 0], sizes = [2, 1], strides = [1, 1]} : vector<16x1xf32> to vector<2x1xf32>
    %304 = vector.broadcast %292 : vector<1x1xf32> to vector<2x1xf32>
    %305 = arith.mulf %304, %302 : vector<2x1xf32>
    %306 = arith.subf %303, %305 : vector<2x1xf32>
    %307 = vector.extract_strided_slice %254 {offsets = [2, 0], sizes = [2, 1], strides = [1, 1]} : vector<16x1xf32> to vector<2x1xf32>
    %308 = arith.mulf %302, %307 : vector<2x1xf32>
    %309 = vector.extract_strided_slice %254 {offsets = [2, 0], sizes = [2, 1], strides = [1, 1]} : vector<16x1xf32> to vector<2x1xf32>
    %310 = arith.mulf %306, %309 : vector<2x1xf32>
    %311 = vector.extract_strided_slice %256 {offsets = [2, 0], sizes = [2, 1], strides = [1, 1]} : vector<16x1xf32> to vector<2x1xf32>
    %312 = arith.addf %310, %311 : vector<2x1xf32>
    %313 = vector.extract_strided_slice %247 {offsets = [4, 0], sizes = [2, 1], strides = [1, 1]} : vector<16x1xf32> to vector<2x1xf32>
    %cst_71 = arith.constant dense<0.000000e+00> : vector<1xf32>
    %314 = vector.multi_reduction <add>, %313, %cst_71 [0] : vector<2x1xf32> to vector<1xf32>
    %315 = vector.shape_cast %314 : vector<1xf32> to vector<1x1xf32>
    %316 = vector.extract_strided_slice %250 {offsets = [4, 0], sizes = [2, 1], strides = [1, 1]} : vector<16x1xf32> to vector<2x1xf32>
    %cst_72 = arith.constant dense<0.000000e+00> : vector<1xf32>
    %317 = vector.multi_reduction <add>, %316, %cst_72 [0] : vector<2x1xf32> to vector<1xf32>
    %318 = vector.shape_cast %317 : vector<1xf32> to vector<1x1xf32>
    %cst_73 = arith.constant 3.906250e-03 : f32
    %319 = vector.broadcast %cst_73 : f32 to vector<1x1xf32>
    %320 = arith.mulf %315, %319 : vector<1x1xf32>
    %cst_74 = arith.constant 3.906250e-03 : f32
    %321 = vector.broadcast %cst_74 : f32 to vector<1x1xf32>
    %322 = arith.mulf %318, %321 : vector<1x1xf32>
    %323 = arith.mulf %320, %320 : vector<1x1xf32>
    %324 = arith.subf %322, %323 : vector<1x1xf32>
    %cst_75 = arith.constant 9.99999974E-6 : f32
    %325 = vector.broadcast %cst_75 : f32 to vector<1x1xf32>
    %326 = arith.addf %324, %325 : vector<1x1xf32>
    %327 = math.rsqrt %326 : vector<1x1xf32>
    %328 = vector.extract_strided_slice %1 {offsets = [4, 0], sizes = [2, 1], strides = [1, 1]} : vector<16x1xf32> to vector<2x1xf32>
    %329 = vector.broadcast %327 : vector<1x1xf32> to vector<2x1xf32>
    %330 = arith.mulf %329, %328 : vector<2x1xf32>
    %331 = vector.extract_strided_slice %2 {offsets = [4, 0], sizes = [2, 1], strides = [1, 1]} : vector<16x1xf32> to vector<2x1xf32>
    %332 = vector.broadcast %320 : vector<1x1xf32> to vector<2x1xf32>
    %333 = arith.mulf %332, %330 : vector<2x1xf32>
    %334 = arith.subf %331, %333 : vector<2x1xf32>
    %335 = vector.extract_strided_slice %254 {offsets = [4, 0], sizes = [2, 1], strides = [1, 1]} : vector<16x1xf32> to vector<2x1xf32>
    %336 = arith.mulf %330, %335 : vector<2x1xf32>
    %337 = vector.extract_strided_slice %254 {offsets = [4, 0], sizes = [2, 1], strides = [1, 1]} : vector<16x1xf32> to vector<2x1xf32>
    %338 = arith.mulf %334, %337 : vector<2x1xf32>
    %339 = vector.extract_strided_slice %256 {offsets = [4, 0], sizes = [2, 1], strides = [1, 1]} : vector<16x1xf32> to vector<2x1xf32>
    %340 = arith.addf %338, %339 : vector<2x1xf32>
    %341 = vector.extract_strided_slice %247 {offsets = [6, 0], sizes = [2, 1], strides = [1, 1]} : vector<16x1xf32> to vector<2x1xf32>
    %cst_76 = arith.constant dense<0.000000e+00> : vector<1xf32>
    %342 = vector.multi_reduction <add>, %341, %cst_76 [0] : vector<2x1xf32> to vector<1xf32>
    %343 = vector.shape_cast %342 : vector<1xf32> to vector<1x1xf32>
    %344 = vector.extract_strided_slice %250 {offsets = [6, 0], sizes = [2, 1], strides = [1, 1]} : vector<16x1xf32> to vector<2x1xf32>
    %cst_77 = arith.constant dense<0.000000e+00> : vector<1xf32>
    %345 = vector.multi_reduction <add>, %344, %cst_77 [0] : vector<2x1xf32> to vector<1xf32>
    %346 = vector.shape_cast %345 : vector<1xf32> to vector<1x1xf32>
    %cst_78 = arith.constant 3.906250e-03 : f32
    %347 = vector.broadcast %cst_78 : f32 to vector<1x1xf32>
    %348 = arith.mulf %343, %347 : vector<1x1xf32>
    %cst_79 = arith.constant 3.906250e-03 : f32
    %349 = vector.broadcast %cst_79 : f32 to vector<1x1xf32>
    %350 = arith.mulf %346, %349 : vector<1x1xf32>
    %351 = arith.mulf %348, %348 : vector<1x1xf32>
    %352 = arith.subf %350, %351 : vector<1x1xf32>
    %cst_80 = arith.constant 9.99999974E-6 : f32
    %353 = vector.broadcast %cst_80 : f32 to vector<1x1xf32>
    %354 = arith.addf %352, %353 : vector<1x1xf32>
    %355 = math.rsqrt %354 : vector<1x1xf32>
    %356 = vector.extract_strided_slice %1 {offsets = [6, 0], sizes = [2, 1], strides = [1, 1]} : vector<16x1xf32> to vector<2x1xf32>
    %357 = vector.broadcast %355 : vector<1x1xf32> to vector<2x1xf32>
    %358 = arith.mulf %357, %356 : vector<2x1xf32>
    %359 = vector.extract_strided_slice %2 {offsets = [6, 0], sizes = [2, 1], strides = [1, 1]} : vector<16x1xf32> to vector<2x1xf32>
    %360 = vector.broadcast %348 : vector<1x1xf32> to vector<2x1xf32>
    %361 = arith.mulf %360, %358 : vector<2x1xf32>
    %362 = arith.subf %359, %361 : vector<2x1xf32>
    %363 = vector.extract_strided_slice %254 {offsets = [6, 0], sizes = [2, 1], strides = [1, 1]} : vector<16x1xf32> to vector<2x1xf32>
    %364 = arith.mulf %358, %363 : vector<2x1xf32>
    %365 = vector.extract_strided_slice %254 {offsets = [6, 0], sizes = [2, 1], strides = [1, 1]} : vector<16x1xf32> to vector<2x1xf32>
    %366 = arith.mulf %362, %365 : vector<2x1xf32>
    %367 = vector.extract_strided_slice %256 {offsets = [6, 0], sizes = [2, 1], strides = [1, 1]} : vector<16x1xf32> to vector<2x1xf32>
    %368 = arith.addf %366, %367 : vector<2x1xf32>
    %369 = vector.extract_strided_slice %247 {offsets = [8, 0], sizes = [2, 1], strides = [1, 1]} : vector<16x1xf32> to vector<2x1xf32>
    %cst_81 = arith.constant dense<0.000000e+00> : vector<1xf32>
    %370 = vector.multi_reduction <add>, %369, %cst_81 [0] : vector<2x1xf32> to vector<1xf32>
    %371 = vector.shape_cast %370 : vector<1xf32> to vector<1x1xf32>
    %372 = vector.extract_strided_slice %250 {offsets = [8, 0], sizes = [2, 1], strides = [1, 1]} : vector<16x1xf32> to vector<2x1xf32>
    %cst_82 = arith.constant dense<0.000000e+00> : vector<1xf32>
    %373 = vector.multi_reduction <add>, %372, %cst_82 [0] : vector<2x1xf32> to vector<1xf32>
    %374 = vector.shape_cast %373 : vector<1xf32> to vector<1x1xf32>
    %cst_83 = arith.constant 3.906250e-03 : f32
    %375 = vector.broadcast %cst_83 : f32 to vector<1x1xf32>
    %376 = arith.mulf %371, %375 : vector<1x1xf32>
    %cst_84 = arith.constant 3.906250e-03 : f32
    %377 = vector.broadcast %cst_84 : f32 to vector<1x1xf32>
    %378 = arith.mulf %374, %377 : vector<1x1xf32>
    %379 = arith.mulf %376, %376 : vector<1x1xf32>
    %380 = arith.subf %378, %379 : vector<1x1xf32>
    %cst_85 = arith.constant 9.99999974E-6 : f32
    %381 = vector.broadcast %cst_85 : f32 to vector<1x1xf32>
    %382 = arith.addf %380, %381 : vector<1x1xf32>
    %383 = math.rsqrt %382 : vector<1x1xf32>
    %384 = vector.extract_strided_slice %1 {offsets = [8, 0], sizes = [2, 1], strides = [1, 1]} : vector<16x1xf32> to vector<2x1xf32>
    %385 = vector.broadcast %383 : vector<1x1xf32> to vector<2x1xf32>
    %386 = arith.mulf %385, %384 : vector<2x1xf32>
    %387 = vector.extract_strided_slice %2 {offsets = [8, 0], sizes = [2, 1], strides = [1, 1]} : vector<16x1xf32> to vector<2x1xf32>
    %388 = vector.broadcast %376 : vector<1x1xf32> to vector<2x1xf32>
    %389 = arith.mulf %388, %386 : vector<2x1xf32>
    %390 = arith.subf %387, %389 : vector<2x1xf32>
    %391 = vector.extract_strided_slice %254 {offsets = [8, 0], sizes = [2, 1], strides = [1, 1]} : vector<16x1xf32> to vector<2x1xf32>
    %392 = arith.mulf %386, %391 : vector<2x1xf32>
    %393 = vector.extract_strided_slice %254 {offsets = [8, 0], sizes = [2, 1], strides = [1, 1]} : vector<16x1xf32> to vector<2x1xf32>
    %394 = arith.mulf %390, %393 : vector<2x1xf32>
    %395 = vector.extract_strided_slice %256 {offsets = [8, 0], sizes = [2, 1], strides = [1, 1]} : vector<16x1xf32> to vector<2x1xf32>
    %396 = arith.addf %394, %395 : vector<2x1xf32>
    %397 = vector.extract_strided_slice %247 {offsets = [10, 0], sizes = [2, 1], strides = [1, 1]} : vector<16x1xf32> to vector<2x1xf32>
    %cst_86 = arith.constant dense<0.000000e+00> : vector<1xf32>
    %398 = vector.multi_reduction <add>, %397, %cst_86 [0] : vector<2x1xf32> to vector<1xf32>
    %399 = vector.shape_cast %398 : vector<1xf32> to vector<1x1xf32>
    %400 = vector.extract_strided_slice %250 {offsets = [10, 0], sizes = [2, 1], strides = [1, 1]} : vector<16x1xf32> to vector<2x1xf32>
    %cst_87 = arith.constant dense<0.000000e+00> : vector<1xf32>
    %401 = vector.multi_reduction <add>, %400, %cst_87 [0] : vector<2x1xf32> to vector<1xf32>
    %402 = vector.shape_cast %401 : vector<1xf32> to vector<1x1xf32>
    %cst_88 = arith.constant 3.906250e-03 : f32
    %403 = vector.broadcast %cst_88 : f32 to vector<1x1xf32>
    %404 = arith.mulf %399, %403 : vector<1x1xf32>
    %cst_89 = arith.constant 3.906250e-03 : f32
    %405 = vector.broadcast %cst_89 : f32 to vector<1x1xf32>
    %406 = arith.mulf %402, %405 : vector<1x1xf32>
    %407 = arith.mulf %404, %404 : vector<1x1xf32>
    %408 = arith.subf %406, %407 : vector<1x1xf32>
    %cst_90 = arith.constant 9.99999974E-6 : f32
    %409 = vector.broadcast %cst_90 : f32 to vector<1x1xf32>
    %410 = arith.addf %408, %409 : vector<1x1xf32>
    %411 = math.rsqrt %410 : vector<1x1xf32>
    %412 = vector.extract_strided_slice %1 {offsets = [10, 0], sizes = [2, 1], strides = [1, 1]} : vector<16x1xf32> to vector<2x1xf32>
    %413 = vector.broadcast %411 : vector<1x1xf32> to vector<2x1xf32>
    %414 = arith.mulf %413, %412 : vector<2x1xf32>
    %415 = vector.extract_strided_slice %2 {offsets = [10, 0], sizes = [2, 1], strides = [1, 1]} : vector<16x1xf32> to vector<2x1xf32>
    %416 = vector.broadcast %404 : vector<1x1xf32> to vector<2x1xf32>
    %417 = arith.mulf %416, %414 : vector<2x1xf32>
    %418 = arith.subf %415, %417 : vector<2x1xf32>
    %419 = vector.extract_strided_slice %254 {offsets = [10, 0], sizes = [2, 1], strides = [1, 1]} : vector<16x1xf32> to vector<2x1xf32>
    %420 = arith.mulf %414, %419 : vector<2x1xf32>
    %421 = vector.extract_strided_slice %254 {offsets = [10, 0], sizes = [2, 1], strides = [1, 1]} : vector<16x1xf32> to vector<2x1xf32>
    %422 = arith.mulf %418, %421 : vector<2x1xf32>
    %423 = vector.extract_strided_slice %256 {offsets = [10, 0], sizes = [2, 1], strides = [1, 1]} : vector<16x1xf32> to vector<2x1xf32>
    %424 = arith.addf %422, %423 : vector<2x1xf32>
    %425 = vector.extract_strided_slice %247 {offsets = [12, 0], sizes = [2, 1], strides = [1, 1]} : vector<16x1xf32> to vector<2x1xf32>
    %cst_91 = arith.constant dense<0.000000e+00> : vector<1xf32>
    %426 = vector.multi_reduction <add>, %425, %cst_91 [0] : vector<2x1xf32> to vector<1xf32>
    %427 = vector.shape_cast %426 : vector<1xf32> to vector<1x1xf32>
    %428 = vector.extract_strided_slice %250 {offsets = [12, 0], sizes = [2, 1], strides = [1, 1]} : vector<16x1xf32> to vector<2x1xf32>
    %cst_92 = arith.constant dense<0.000000e+00> : vector<1xf32>
    %429 = vector.multi_reduction <add>, %428, %cst_92 [0] : vector<2x1xf32> to vector<1xf32>
    %430 = vector.shape_cast %429 : vector<1xf32> to vector<1x1xf32>
    %cst_93 = arith.constant 3.906250e-03 : f32
    %431 = vector.broadcast %cst_93 : f32 to vector<1x1xf32>
    %432 = arith.mulf %427, %431 : vector<1x1xf32>
    %cst_94 = arith.constant 3.906250e-03 : f32
    %433 = vector.broadcast %cst_94 : f32 to vector<1x1xf32>
    %434 = arith.mulf %430, %433 : vector<1x1xf32>
    %435 = arith.mulf %432, %432 : vector<1x1xf32>
    %436 = arith.subf %434, %435 : vector<1x1xf32>
    %cst_95 = arith.constant 9.99999974E-6 : f32
    %437 = vector.broadcast %cst_95 : f32 to vector<1x1xf32>
    %438 = arith.addf %436, %437 : vector<1x1xf32>
    %439 = math.rsqrt %438 : vector<1x1xf32>
    %440 = vector.extract_strided_slice %1 {offsets = [12, 0], sizes = [2, 1], strides = [1, 1]} : vector<16x1xf32> to vector<2x1xf32>
    %441 = vector.broadcast %439 : vector<1x1xf32> to vector<2x1xf32>
    %442 = arith.mulf %441, %440 : vector<2x1xf32>
    %443 = vector.extract_strided_slice %2 {offsets = [12, 0], sizes = [2, 1], strides = [1, 1]} : vector<16x1xf32> to vector<2x1xf32>
    %444 = vector.broadcast %432 : vector<1x1xf32> to vector<2x1xf32>
    %445 = arith.mulf %444, %442 : vector<2x1xf32>
    %446 = arith.subf %443, %445 : vector<2x1xf32>
    %447 = vector.extract_strided_slice %254 {offsets = [12, 0], sizes = [2, 1], strides = [1, 1]} : vector<16x1xf32> to vector<2x1xf32>
    %448 = arith.mulf %442, %447 : vector<2x1xf32>
    %449 = vector.extract_strided_slice %254 {offsets = [12, 0], sizes = [2, 1], strides = [1, 1]} : vector<16x1xf32> to vector<2x1xf32>
    %450 = arith.mulf %446, %449 : vector<2x1xf32>
    %451 = vector.extract_strided_slice %256 {offsets = [12, 0], sizes = [2, 1], strides = [1, 1]} : vector<16x1xf32> to vector<2x1xf32>
    %452 = arith.addf %450, %451 : vector<2x1xf32>
    %453 = vector.extract_strided_slice %247 {offsets = [14, 0], sizes = [2, 1], strides = [1, 1]} : vector<16x1xf32> to vector<2x1xf32>
    %cst_96 = arith.constant dense<0.000000e+00> : vector<1xf32>
    %454 = vector.multi_reduction <add>, %453, %cst_96 [0] : vector<2x1xf32> to vector<1xf32>
    %455 = vector.shape_cast %454 : vector<1xf32> to vector<1x1xf32>
    %456 = vector.extract_strided_slice %250 {offsets = [14, 0], sizes = [2, 1], strides = [1, 1]} : vector<16x1xf32> to vector<2x1xf32>
    %cst_97 = arith.constant dense<0.000000e+00> : vector<1xf32>
    %457 = vector.multi_reduction <add>, %456, %cst_97 [0] : vector<2x1xf32> to vector<1xf32>
    %458 = vector.shape_cast %457 : vector<1xf32> to vector<1x1xf32>
    %cst_98 = arith.constant 3.906250e-03 : f32
    %459 = vector.broadcast %cst_98 : f32 to vector<1x1xf32>
    %460 = arith.mulf %455, %459 : vector<1x1xf32>
    %cst_99 = arith.constant 3.906250e-03 : f32
    %461 = vector.broadcast %cst_99 : f32 to vector<1x1xf32>
    %462 = arith.mulf %458, %461 : vector<1x1xf32>
    %463 = arith.mulf %460, %460 : vector<1x1xf32>
    %464 = arith.subf %462, %463 : vector<1x1xf32>
    %cst_100 = arith.constant 9.99999974E-6 : f32
    %465 = vector.broadcast %cst_100 : f32 to vector<1x1xf32>
    %466 = arith.addf %464, %465 : vector<1x1xf32>
    %467 = math.rsqrt %466 : vector<1x1xf32>
    %468 = vector.extract_strided_slice %1 {offsets = [14, 0], sizes = [2, 1], strides = [1, 1]} : vector<16x1xf32> to vector<2x1xf32>
    %469 = vector.broadcast %467 : vector<1x1xf32> to vector<2x1xf32>
    %470 = arith.mulf %469, %468 : vector<2x1xf32>
    %471 = vector.extract_strided_slice %2 {offsets = [14, 0], sizes = [2, 1], strides = [1, 1]} : vector<16x1xf32> to vector<2x1xf32>
    %472 = vector.broadcast %460 : vector<1x1xf32> to vector<2x1xf32>
    %473 = arith.mulf %472, %470 : vector<2x1xf32>
    %474 = arith.subf %471, %473 : vector<2x1xf32>
    %475 = vector.extract_strided_slice %254 {offsets = [14, 0], sizes = [2, 1], strides = [1, 1]} : vector<16x1xf32> to vector<2x1xf32>
    %476 = arith.mulf %470, %475 : vector<2x1xf32>
    %477 = vector.extract_strided_slice %254 {offsets = [14, 0], sizes = [2, 1], strides = [1, 1]} : vector<16x1xf32> to vector<2x1xf32>
    %478 = arith.mulf %474, %477 : vector<2x1xf32>
    %479 = vector.extract_strided_slice %256 {offsets = [14, 0], sizes = [2, 1], strides = [1, 1]} : vector<16x1xf32> to vector<2x1xf32>
    %480 = arith.addf %478, %479 : vector<2x1xf32>
    %481 = tpu.concatenate %280, %308, %336, %364, %392, %420, %448, %476 in 0 : vector<2x1xf32>, vector<2x1xf32>, vector<2x1xf32>, vector<2x1xf32>, vector<2x1xf32>, vector<2x1xf32>, vector<2x1xf32>, vector<2x1xf32> -> vector<16x1xf32>
    %482 = tpu.concatenate %284, %312, %340, %368, %396, %424, %452, %480 in 0 : vector<2x1xf32>, vector<2x1xf32>, vector<2x1xf32>, vector<2x1xf32>, vector<2x1xf32>, vector<2x1xf32>, vector<2x1xf32>, vector<2x1xf32> -> vector<16x1xf32>
    %483 = vector.broadcast %481 : vector<16x1xf32> to vector<16x128xf32>
    %484 = arith.mulf %245, %483 : vector<16x128xf32>
    %485 = vector.broadcast %482 : vector<16x1xf32> to vector<16x128xf32>
    %486 = arith.addf %484, %485 : vector<16x128xf32>
    %487 = tpu.concatenate %244, %486 in 1 : vector<16x128xf32>, vector<16x128xf32> -> vector<16x256xf32>
    %488 = arith.negf %487 : vector<16x256xf32>
    %489 = math.exp %488 : vector<16x256xf32>
    %cst_101 = arith.constant 1.000000e+00 : f32
    %490 = vector.broadcast %cst_101 : f32 to vector<16x256xf32>
    %491 = arith.addf %490, %489 : vector<16x256xf32>
    %492 = arith.divf %490, %491 : vector<16x256xf32>
    %493 = arith.mulf %487, %492 : vector<16x256xf32>
    %494 = tpu.iota {dimensions = array<i32: 1>} : vector<1x256xi32>
    %c128_i32 = arith.constant 128 : i32
    %c0_i32 = arith.constant 0 : i32
    %495 = arith.cmpi eq, %c128_i32, %c0_i32 : i32
    %c1_i32 = arith.constant 1 : i32
    %496 = arith.select %495, %c1_i32, %c128_i32 : i32
    %497 = vector.broadcast %496 : i32 to vector<1x256xi32>
    %498 = arith.remsi %494, %497 : vector<1x256xi32>
    %c0_i32_102 = arith.constant 0 : i32
    %499 = vector.broadcast %c0_i32_102 : i32 to vector<1x256xi32>
    %500 = arith.cmpi ne, %498, %499 : vector<1x256xi32>
    %c0_i32_103 = arith.constant 0 : i32
    %501 = vector.broadcast %c0_i32_103 : i32 to vector<1x256xi32>
    %502 = arith.cmpi slt, %498, %501 : vector<1x256xi32>
    %c0_i32_104 = arith.constant 0 : i32
    %503 = arith.cmpi slt, %496, %c0_i32_104 : i32
    %504 = vector.broadcast %503 : i1 to vector<1x256xi1>
    %505 = vector.broadcast %504 : vector<1x256xi1> to vector<1x256xi1>
    %506 = arith.xori %502, %505 : vector<1x256xi1>
    %507 = arith.andi %506, %500 : vector<1x256xi1>
    %508 = vector.broadcast %496 : i32 to vector<1x256xi32>
    %509 = arith.addi %498, %508 : vector<1x256xi32>
    %510 = arith.select %507, %509, %498 : vector<1x256xi1>, vector<1x256xi32>
    %c3_i32 = arith.constant 3 : i32
    %511 = tpu.dynamic_rotate %493 by %c3_i32 dim 1 : vector<16x256xf32>, i32 -> vector<16x256xf32>
    %c3_i32_105 = arith.constant 3 : i32
    %512 = vector.broadcast %c3_i32_105 : i32 to vector<1x256xi32>
    %513 = arith.cmpi sge, %510, %512 : vector<1x256xi32>
    %cst_106 = arith.constant 0.000000e+00 : f32
    %514 = vector.shape_cast %513 : vector<1x256xi1> to vector<1x256xi1>
    %515 = vector.broadcast %514 : vector<1x256xi1> to vector<16x256xi1>
    %516 = vector.broadcast %cst_106 : f32 to vector<16x256xf32>
    %517 = arith.select %515, %511, %516 : vector<16x256xi1>, vector<16x256xf32>
    %518 = arith.truncf %517 : vector<16x256xf32> to vector<16x256xbf16>
    %c2_i32 = arith.constant 2 : i32
    %519 = tpu.dynamic_rotate %493 by %c2_i32 dim 1 : vector<16x256xf32>, i32 -> vector<16x256xf32>
    %c2_i32_107 = arith.constant 2 : i32
    %520 = vector.broadcast %c2_i32_107 : i32 to vector<1x256xi32>
    %521 = arith.cmpi sge, %510, %520 : vector<1x256xi32>
    %cst_108 = arith.constant 0.000000e+00 : f32
    %522 = vector.shape_cast %521 : vector<1x256xi1> to vector<1x256xi1>
    %523 = vector.broadcast %522 : vector<1x256xi1> to vector<16x256xi1>
    %524 = vector.broadcast %cst_108 : f32 to vector<16x256xf32>
    %525 = arith.select %523, %519, %524 : vector<16x256xi1>, vector<16x256xf32>
    %526 = arith.truncf %525 : vector<16x256xf32> to vector<16x256xbf16>
    %c1_i32_109 = arith.constant 1 : i32
    %527 = tpu.dynamic_rotate %493 by %c1_i32_109 dim 1 : vector<16x256xf32>, i32 -> vector<16x256xf32>
    %c1_i32_110 = arith.constant 1 : i32
    %528 = vector.broadcast %c1_i32_110 : i32 to vector<1x256xi32>
    %529 = arith.cmpi sge, %510, %528 : vector<1x256xi32>
    %cst_111 = arith.constant 0.000000e+00 : f32
    %530 = vector.shape_cast %529 : vector<1x256xi1> to vector<1x256xi1>
    %531 = vector.broadcast %530 : vector<1x256xi1> to vector<16x256xi1>
    %532 = vector.broadcast %cst_111 : f32 to vector<16x256xf32>
    %533 = arith.select %531, %527, %532 : vector<16x256xi1>, vector<16x256xf32>
    %534 = arith.truncf %533 : vector<16x256xf32> to vector<16x256xbf16>
    %535 = arith.truncf %493 : vector<16x256xf32> to vector<16x256xbf16>
    %c255_i32 = arith.constant 255 : i32
    %536 = tpu.dynamic_rotate %493 by %c255_i32 dim 1 : vector<16x256xf32>, i32 -> vector<16x256xf32>
    %c127_i32 = arith.constant 127 : i32
    %537 = vector.broadcast %c127_i32 : i32 to vector<1x256xi32>
    %538 = arith.cmpi slt, %510, %537 : vector<1x256xi32>
    %cst_112 = arith.constant 0.000000e+00 : f32
    %539 = vector.shape_cast %538 : vector<1x256xi1> to vector<1x256xi1>
    %540 = vector.broadcast %539 : vector<1x256xi1> to vector<16x256xi1>
    %541 = vector.broadcast %cst_112 : f32 to vector<16x256xf32>
    %542 = arith.select %540, %536, %541 : vector<16x256xi1>, vector<16x256xf32>
    %543 = arith.truncf %542 : vector<16x256xf32> to vector<16x256xbf16>
    %c254_i32 = arith.constant 254 : i32
    %544 = tpu.dynamic_rotate %493 by %c254_i32 dim 1 : vector<16x256xf32>, i32 -> vector<16x256xf32>
    %c126_i32 = arith.constant 126 : i32
    %545 = vector.broadcast %c126_i32 : i32 to vector<1x256xi32>
    %546 = arith.cmpi slt, %510, %545 : vector<1x256xi32>
    %cst_113 = arith.constant 0.000000e+00 : f32
    %547 = vector.shape_cast %546 : vector<1x256xi1> to vector<1x256xi1>
    %548 = vector.broadcast %547 : vector<1x256xi1> to vector<16x256xi1>
    %549 = vector.broadcast %cst_113 : f32 to vector<16x256xf32>
    %550 = arith.select %548, %544, %549 : vector<16x256xi1>, vector<16x256xf32>
    %551 = arith.truncf %550 : vector<16x256xf32> to vector<16x256xbf16>
    %c253_i32 = arith.constant 253 : i32
    %552 = tpu.dynamic_rotate %493 by %c253_i32 dim 1 : vector<16x256xf32>, i32 -> vector<16x256xf32>
    %c125_i32 = arith.constant 125 : i32
    %553 = vector.broadcast %c125_i32 : i32 to vector<1x256xi32>
    %554 = arith.cmpi slt, %510, %553 : vector<1x256xi32>
    %cst_114 = arith.constant 0.000000e+00 : f32
    %555 = vector.shape_cast %554 : vector<1x256xi1> to vector<1x256xi1>
    %556 = vector.broadcast %555 : vector<1x256xi1> to vector<16x256xi1>
    %557 = vector.broadcast %cst_114 : f32 to vector<16x256xf32>
    %558 = arith.select %556, %552, %557 : vector<16x256xi1>, vector<16x256xf32>
    %559 = arith.truncf %558 : vector<16x256xf32> to vector<16x256xbf16>
    %cst_115 = arith.constant 0.000000e+00 : bf16
    %560 = vector.broadcast %cst_115 : bf16 to vector<16x256xbf16>
    %561 = tpu.concatenate %518, %526, %534, %535, %543, %551, %559, %560 in 0 : vector<16x256xbf16>, vector<16x256xbf16>, vector<16x256xbf16>, vector<16x256xbf16>, vector<16x256xbf16>, vector<16x256xbf16>, vector<16x256xbf16>, vector<16x256xbf16> -> vector<128x256xbf16>
    %c0_116 = arith.constant 0 : index
    %c0_117 = arith.constant 0 : index
    %562 = vector.load %arg6[%c0_116, %c0_117] : memref<32x128xbf16, #tpu.memory_space<vmem>>, vector<32x128xbf16>
    %cst_118 = arith.constant dense<0.000000e+00> : vector<32x256xf32>
    %563 = tpu.matmul %562, %561, %cst_118 {dimension_numbers = #tpu.dot_dimension_numbers<[1], [0], [0], [1], [0, 0, 1, 1], [], []>} : vector<32x128xbf16>, vector<128x256xbf16>, vector<32x256xf32> -> vector<32x256xf32>
    %c0_119 = arith.constant 0 : index
    %c0_120 = arith.constant 0 : index
    %564 = vector.load %arg7[%c0_119, %c0_120] : memref<32x1xf32, #tpu.memory_space<vmem>>, vector<32x1xf32>
    %565 = vector.broadcast %564 : vector<32x1xf32> to vector<32x256xf32>
    %566 = arith.addf %563, %565 : vector<32x256xf32>
    %c0_121 = arith.constant 0 : index
    %c0_122 = arith.constant 0 : index
    %567 = vector.load %arg8[%c0_121, %c0_122] : memref<32x256xf32, #tpu.memory_space<vmem>>, vector<32x256xf32>
    tpu.vector_store %arg8[%c0_121, %c0_122], %566 {strides = array<i32>} : memref<32x256xf32, #tpu.memory_space<vmem>>, vector<32x256xf32>,
    return
  }
  func.func @transform_0(%arg0: i32) -> (i32, i32) {
    %c0_i32 = arith.constant 0 : i32
    %c0_i32_0 = arith.constant 0 : i32
    return %c0_i32, %arg0 : i32, i32
  }
  func.func @transform_1(%arg0: i32) -> (i32, i32) {
    %c0_i32 = arith.constant 0 : i32
    %c0_i32_0 = arith.constant 0 : i32
    %c0_i32_1 = arith.constant 0 : i32
    return %c0_i32, %c0_i32_0 : i32, i32
  }
  func.func @transform_2(%arg0: i32) -> (i32, i32) {
    %c0_i32 = arith.constant 0 : i32
    %c0_i32_0 = arith.constant 0 : i32
    %c0_i32_1 = arith.constant 0 : i32
    return %c0_i32, %c0_i32_0 : i32, i32
  }
  func.func @transform_3(%arg0: i32) -> (i32, i32, i32) {
    %c0_i32 = arith.constant 0 : i32
    %c0_i32_0 = arith.constant 0 : i32
    %c0_i32_1 = arith.constant 0 : i32
    return %arg0, %c0_i32, %c0_i32_0 : i32, i32, i32
  }
  func.func @transform_4(%arg0: i32) -> (i32, i32, i32) {
    %c0_i32 = arith.constant 0 : i32
    %c0_i32_0 = arith.constant 0 : i32
    %c0_i32_1 = arith.constant 0 : i32
    return %arg0, %c0_i32, %c0_i32_0 : i32, i32, i32
  }
  func.func @transform_5(%arg0: i32) -> (i32, i32) {
    %c0_i32 = arith.constant 0 : i32
    %c0_i32_0 = arith.constant 0 : i32
    %c0_i32_1 = arith.constant 0 : i32
    return %c0_i32, %c0_i32_0 : i32, i32
  }
  func.func @transform_6(%arg0: i32) -> (i32, i32) {
    %c0_i32 = arith.constant 0 : i32
    %c0_i32_0 = arith.constant 0 : i32
    %c0_i32_1 = arith.constant 0 : i32
    return %c0_i32, %c0_i32_0 : i32, i32
  }
  func.func @transform_7(%arg0: i32) -> (i32, i32) {
    %c0_i32 = arith.constant 0 : i32
    %c0_i32_0 = arith.constant 0 : i32
    return %c0_i32, %arg0 : i32, i32
  }
}

</mosaic_0001>

<bundles_post_ra>
// kernel: tpu_custom_call.1
= control target key start
LH: loop header
LB: loop body
LE: loop exit
PB: predicated region body
PF: predicated region fallthrough
CT: control target
= control target key end

     0   :  { %s1693_s0 = inlined_call_operand.vmem [shape: f32[16,256], index: 0, kind: input, shape index: {}]   ;;  %s1694_s1 = inlined_call_operand.vmem [shape: f32[16,1], index: 1, kind: input, shape index: {}]   ;;  %s1695_s2 = inlined_call_operand.vmem [shape: f32[16,1], index: 2, kind: input, shape index: {}]   ;;  %s1696_s3 = inlined_call_operand.vmem [shape: f32[2,16,1], index: 3, kind: input, shape index: {}]   ;;  %s1697_s4 = inlined_call_operand.vmem [shape: f32[2,16,1], index: 4, kind: input, shape index: {}]   ;;  %s1698_s5 = inlined_call_operand.vmem [shape: bf16[32,128], index: 5, kind: input, shape index: {}]   ;;  %s1699_s6 = inlined_call_operand.vmem [shape: f32[32,1], index: 6, kind: input, shape index: {}]   ;;  %s1700_s7 = inlined_call_operand.hbm [shape: f32[32,256], index: 7, kind: output, shape index: {}]  }
   0x1   :  { %v29_v0 = vld [vmem:[%s1693_s0 + $0x8] sm:$0xff]  ;;  %v28_v1 = vld [vmem:[%s1693_s0] sm:$0xff]  ;;  %v31_v2 = vld [vmem:[%s1693_s0 + $0x18] sm:$0xff] }
   0x2   :  { %327 = vadd.xlane.f32.xlu1 %v29_v0  ;;  %36 = vadd.xlane.f32.xlu0 %v28_v1  ;;  %v30_v3 = vld [vmem:[%s1693_s0 + $0x10] sm:$0xff] }
   0x3   :  { %12 = vsyncpa [#allocation3], 0  ;;  %v41_v4 = vmul.f32 %v30_v3, %v30_v3  ;;  %v40_v5 = vmul.f32 %v28_v1, %v28_v1  ;;  %v332_v6 = vmul.f32 %v31_v2, %v31_v2  ;;  %v331_v7 = vmul.f32 %v29_v0, %v29_v0  ;;  %s1153_s14 = smov 2   ;;  %s1154_s15 = smov 1  }
   0x4   :  { %v1151_v8 = vmov 0   ;;  %vm52_vm0 = vcmask 1041408   ;;  %vm290_vm1 = vcmask 1043456   ;;  %vm292_vm2 = vcmask 1045504   ;;  %s1155_s16 = smov 127   ;;  %s1156_s17 = smov 126  }
   0x5   :  { %1012 = vset.pattern.permute.xlu1 %v1151_v8  ;;  %1011 = vset.pattern.permute.xlu0 %v1151_v8  ;;  %s1157_s18 = smov 125   ;;  %s1158_s27 = smov [#allocation2]  }
   0x6   :  { %329 = vadd.xlane.f32.xlu1 %v31_v2  ;;  %38 = vadd.xlane.f32.xlu0 %v30_v3  ;;  %s930_s28 = sshll.u32 %s1158_s27, 4  ;;  %s931_s28 = int_to_ptr.vmem [resolvable:$true] %s930_s28 }
   0x7   :  { %896 = vmatprep.mubr.bf16.mxu0 %v1151_v8  ;;  %906 = vmatprep.mubr.bf16.mxu1 %v1151_v8  ;;  %p1132_p1 = scmp.lt.s32.totalorder %s931_s28, %s931_s28 }
   0xa   :  { %44 = vadd.xlane.f32.xlu1 %v41_v4  ;;  %42 = vadd.xlane.f32.xlu0 %v40_v5 }
   0xe   :  { %335 = vadd.xlane.f32.xlu1 %v332_v6  ;;  %333 = vadd.xlane.f32.xlu0 %v331_v7 }
  0x8f   :  { %v328_v9 = vpop.xlane.xlu1 %327  ;;  %v37_v10 = vpop.xlane.xlu0 %36 }
  0x90   :  { %v345_v11 = vsel %vm52_vm0, %v328_v9, 0.0  ;;  %v372_v12 = vrot.slane %v328_v9, 2  ;;  %v403_v13 = vrot.slane %v328_v9, 4  ;;  %v433_v14 = vrot.slane %v328_v9, 6 }
  0x91   :  { %v346_v15 = vrot.slane %v345_v11, 4  ;;  %v53_v16 = vsel %vm52_vm0, %v37_v10, 0.0  ;;  %v80_v17 = vrot.slane %v37_v10, 2  ;;  %v111_v18 = vrot.slane %v37_v10, 4 }
  0x92   :  { %v374_v19 = vsel %vm52_vm0, %v372_v12, 0.0  ;;  %v405_v20 = vsel %vm52_vm0, %v403_v13, 0.0  ;;  %v435_v21 = vsel %vm52_vm0, %v433_v14, 0.0  ;;  %v54_v22 = vrot.slane %v53_v16, 4 }
  0x93   :  { %v347_v23 = vadd.f32 %v346_v15, %v345_v11  ;;  %v375_v24 = vrot.slane %v374_v19, 4  ;;  %v406_v25 = vrot.slane %v405_v20, 4  ;;  %v82_v27 = vsel %vm52_vm0, %v80_v17, 0.0  ;;  %v330_v44 = vpop.xlane.xlu1 %329  ;;  %v39_v58 = vpop.xlane.xlu0 %38 }
  0x94   :  { %v55_v26 = vadd.f32 %v54_v22, %v53_v16  ;;  %v113_v28 = vsel %vm52_vm0, %v111_v18, 0.0  ;;  %v436_v30 = vrot.slane %v435_v21, 4  ;;  %v141_v31 = vrot.slane %v37_v10, 6 }
  0x95   :  { %v348_v29 = vrot.slane %v347_v23, 2  ;;  %v376_v32 = vadd.f32 %v375_v24, %v374_v19  ;;  %v407_v33 = vadd.f32 %v406_v25, %v405_v20  ;;  %v83_v34 = vrot.slane %v82_v27, 4 }
  0x96   :  { %v114_v35 = vrot.slane %v113_v28, 4  ;;  %v56_v36 = vrot.slane %v55_v26, 2  ;;  %v437_v38 = vadd.f32 %v436_v30, %v435_v21  ;;  %v143_v41 = vsel %vm52_vm0, %v141_v31, 0.0 }
  0x97   :  { %v349_v37 = vadd.f32 %v348_v29, %v347_v23  ;;  %v84_v39 = vadd.f32 %v83_v34, %v82_v27  ;;  %v377_v42 = vrot.slane %v376_v32, 2  ;;  %v408_v43 = vrot.slane %v407_v33, 2 }
  0x98   :  { %v115_v40 = vadd.f32 %v114_v35, %v113_v28  ;;  %v57_v45 = vadd.f32 %v56_v36, %v55_v26  ;;  %v144_v47 = vrot.slane %v143_v41, 4  ;;  %v438_v48 = vrot.slane %v437_v38, 2 }
  0x99   :  { %v350_v46 = vrot.slane %v349_v37, 1  ;;  %v85_v49 = vrot.slane %v84_v39, 2  ;;  %v463_v51 = vsel %vm52_vm0, %v330_v44, 0.0  ;;  %v378_v52 = vadd.f32 %v377_v42, %v376_v32 }
  0x9a   :  { %v116_v50 = vrot.slane %v115_v40, 2  ;;  %v409_v53 = vadd.f32 %v408_v43, %v407_v33  ;;  %v58_v54 = vrot.slane %v57_v45, 1  ;;  %v464_v55 = vrot.slane %v463_v51, 4  ;;  %v45_v43 = vpop.xlane.xlu1 %44 }
  0x9b   :  { %v351_v56 = vadd.f32 %v350_v46, %v349_v37  ;;  %v145_v57 = vadd.f32 %v144_v47, %v143_v41  ;;  %v1222_v59 = vadd.f32 %v438_v48, %v437_v38  ;;  %v86_v60 = vadd.f32 %v85_v49, %v84_v39 }
  0x9c   :  { %v117_v61 = vadd.f32 %v116_v50, %v115_v40  ;;  %v490_v62 = vrot.slane %v330_v44, 2  ;;  %v379_v63 = vrot.slane %v378_v52, 1  ;;  %v410_v0 = vrot.slane %v409_v53, 1 }
  0x9d   :  { %v465_v1 = vadd.f32 %v464_v55, %v463_v51  ;;  %v521_v2 = vrot.slane %v330_v44, 4  ;;  %v59_v3 = vadd.f32 %v58_v54, %v57_v45  ;;  %v171_v5 = vsel %vm52_vm0, %v39_v58, 0.0 }
  0x9e   :  { %v492_v4 = vsel %vm52_vm0, %v490_v62, 0.0  ;;  %v198_v6 = vrot.slane %v39_v58, 2  ;;  %v1226_v7 = vmul.f32 0.00390625, %v351_v56  ;;  %v146_v8 = vrot.slane %v145_v57, 2 }
  0x9f   :  { %v493_v9 = vrot.slane %v492_v4, 4  ;;  %v523_v10 = vsel %vm52_vm0, %v521_v2, 0.0  ;;  %v87_v11 = vrot.slane %v86_v60, 1  ;;  %v118_v12 = vrot.slane %v117_v61, 1 }
  0xa0   :  { %v524_v13 = vrot.slane %v523_v10, 4  ;;  %v172_v14 = vrot.slane %v171_v5, 4  ;;  %v466_v15 = vrot.slane %v465_v1, 2  ;;  %v551_v16 = vrot.slane %v330_v44, 6 }
  0xa1   :  { %v200_v17 = vsel %vm52_vm0, %v198_v6, 0.0  ;;  %v229_v18 = vrot.slane %v39_v58, 4  ;;  %v494_v19 = vadd.f32 %v493_v9, %v492_v4  ;;  %v380_v23 = vadd.f32 %v379_v63, %v378_v52 }
  0xa2   :  { %v525_v20 = vadd.f32 %v524_v13, %v523_v10  ;;  %v173_v21 = vadd.f32 %v172_v14, %v171_v5  ;;  %v201_v22 = vrot.slane %v200_v17, 4  ;;  %v411_v24 = vadd.f32 %v410_v0, %v409_v53  ;;  %v43_v5 = vpop.xlane.xlu0 %42 }
  0xa3   :  { %v1230_v25 = vmul.f32 0.00390625, %v59_v3  ;;  %v231_v26 = vsel %vm52_vm0, %v229_v18, 0.0  ;;  %v88_v27 = vadd.f32 %v87_v11, %v86_v60  ;;  %v259_v30 = vrot.slane %v39_v58, 6 }
  0xa4   :  { %v174_v28 = vrot.slane %v173_v21, 2  ;;  %v202_v29 = vadd.f32 %v201_v22, %v200_v17  ;;  %v119_v32 = vadd.f32 %v118_v12, %v117_v61  ;;  %v1234_v33 = vadd.f32 %v146_v8, %v145_v57 }
  0xa5   :  { %v232_v34 = vrot.slane %v231_v26, 4  ;;  %v467_v35 = vadd.f32 %v466_v15, %v465_v1  ;;  %v495_v36 = vrot.slane %v494_v19, 2  ;;  %v526_v37 = vrot.slane %v525_v20, 2 }
  0xa6   :  { %v553_v38 = vsel %vm52_vm0, %v551_v16, 0.0  ;;  %v1239_v39 = vmul.f32 %v1226_v7, %v1226_v7  ;;  %v1241_v40 = vmul.f32 0.00390625, %v380_v23  ;;  %v1243_v41 = vmul.f32 0.00390625, %v411_v24 }
  0xa7   :  { %v175_v42 = vadd.f32 %v174_v28, %v173_v21  ;;  %v1247_v44 = vmul.f32 %v1230_v25, %v1230_v25  ;;  %v1249_v45 = vmul.f32 0.00390625, %v88_v27  ;;  %v203_v46 = vrot.slane %v202_v29, 2 }
  0xa8   :  { %v261_v47 = vsel %vm52_vm0, %v259_v30, 0.0  ;;  %v1252_v48 = vmul.f32 0.00390625, %v119_v32  ;;  %v554_v50 = vrot.slane %v553_v38, 4  ;;  %v233_v51 = vadd.f32 %v232_v34, %v231_v26 }
  0xa9   :  { %v468_v52 = vrot.slane %v467_v35, 1  ;;  %v496_v53 = vadd.f32 %v495_v36, %v494_v19  ;;  %v527_v54 = vadd.f32 %v526_v37, %v525_v20  ;;  %v178_v55 = vsel %vm52_vm0, %v45_v43, 0.0 }
  0xaa   :  { %v1258_v56 = vmul.f32 %v1241_v40, %v1241_v40  ;;  %v176_v57 = vrot.slane %v175_v42, 1  ;;  %v262_v58 = vrot.slane %v261_v47, 4  ;;  %v179_v60 = vrot.slane %v178_v55, 4 }
  0xab   :  { %v1262_v61 = vmul.f32 %v1243_v41, %v1243_v41  ;;  %v1266_v62 = vmul.f32 %v1249_v45, %v1249_v45  ;;  %v204_v63 = vadd.f32 %v203_v46, %v202_v29  ;;  %v208_v0 = vrot.slane %v45_v43, 2 }
  0xac   :  { %v1270_v1 = vmul.f32 %v1252_v48, %v1252_v48  ;;  %v1272_v2 = vadd.f32 %v554_v50, %v553_v38  ;;  %v234_v3 = vrot.slane %v233_v51, 2  ;;  %v180_v4 = vadd.f32 %v179_v60, %v178_v55 }
  0xad   :  { %v469_v6 = vadd.f32 %v468_v52, %v467_v35  ;;  %v497_v8 = vrot.slane %v496_v53, 1  ;;  %v528_v9 = vrot.slane %v527_v54, 1  ;;  %v210_v10 = vsel %vm52_vm0, %v208_v0, 0.0 }
  0xae   :  { %v177_v11 = vadd.f32 %v176_v57, %v175_v42  ;;  %v263_v12 = vadd.f32 %v262_v58, %v261_v47  ;;  %v181_v13 = vrot.slane %v180_v4, 2  ;;  %v211_v14 = vrot.slane %v210_v10, 4 }
  0xaf   :  { %v205_v15 = vrot.slane %v204_v63, 1  ;;  %v238_v16 = vrot.slane %v45_v43, 4  ;;  %v268_v17 = vrot.slane %v45_v43, 6  ;;  %v60_v18 = vsel %vm52_vm0, %v43_v5, 0.0 }
  0xb0   :  { %v235_v19 = vadd.f32 %v234_v3, %v233_v51  ;;  %v182_v20 = vadd.f32 %v181_v13, %v180_v4  ;;  %v212_v21 = vadd.f32 %v211_v14, %v210_v10  ;;  %v61_v22 = vrot.slane %v60_v18, 4 }
  0xb1   :  { %v240_v23 = vsel %vm52_vm0, %v238_v16, 0.0  ;;  %v270_v24 = vsel %vm52_vm0, %v268_v17, 0.0  ;;  %v90_v26 = vrot.slane %v43_v5, 2  ;;  %v120_v27 = vrot.slane %v43_v5, 4 }
  0xb2   :  { %v1278_v28 = vmul.f32 0.00390625, %v177_v11  ;;  %v183_v29 = vrot.slane %v182_v20, 1  ;;  %v213_v30 = vrot.slane %v212_v21, 2  ;;  %v241_v32 = vrot.slane %v240_v23, 4 }
  0xb3   :  { %v271_v34 = vrot.slane %v270_v24, 4  ;;  %v62_v35 = vadd.f32 %v61_v22, %v60_v18  ;;  %v92_v36 = vsel %vm52_vm0, %v90_v26, 0.0  ;;  %v122_v37 = vsel %vm52_vm0, %v120_v27, 0.0 }
  0xb4   :  { %v184_v38 = vadd.f32 %v183_v29, %v182_v20  ;;  %v214_v42 = vadd.f32 %v213_v30, %v212_v21  ;;  %v242_v43 = vadd.f32 %v241_v32, %v240_v23  ;;  %v93_v46 = vrot.slane %v92_v36, 4  ;;  %v336_v23 = vpop.xlane.xlu1 %335 }
  0xb5   :  { %v206_v47 = vadd.f32 %v205_v15, %v204_v63  ;;  %v63_v50 = vrot.slane %v62_v35, 2  ;;  %v123_v51 = vrot.slane %v122_v37, 4  ;;  %v150_v52 = vrot.slane %v43_v5, 6 }
  0xb6   :  { %v236_v55 = vrot.slane %v235_v19, 1  ;;  %v215_v57 = vrot.slane %v214_v42, 1  ;;  %v243_v58 = vrot.slane %v242_v43, 2  ;;  %v94_v60 = vadd.f32 %v93_v46, %v92_v36 }
  0xb7   :  { %v498_v0 = vadd.f32 %v497_v8, %v496_v53  ;;  %v272_v3 = vadd.f32 %v271_v34, %v270_v24  ;;  %v64_v4 = vadd.f32 %v63_v50, %v62_v35  ;;  %v124_v10 = vadd.f32 %v123_v51, %v122_v37 }
  0xb8   :  { %v529_v11 = vadd.f32 %v528_v9, %v527_v54  ;;  %v186_v13 = vmul.f32 0.00390625, %v184_v38  ;;  %v216_v14 = vadd.f32 %v215_v57, %v214_v42  ;;  %v152_v16 = vsel %vm52_vm0, %v150_v52, 0.0 }
  0xb9   :  { %v1283_v17 = vmul.f32 0.00390625, %v469_v6  ;;  %v264_v18 = vrot.slane %v263_v12, 2  ;;  %v244_v63 = vadd.f32 %v243_v58, %v242_v43  ;;  %v95_v15 = vrot.slane %v94_v60, 2 }
  0xba   :  { %v187_v5 = vmul.f32 %v1278_v28, %v1278_v28  ;;  %v1287_v20 = vmul.f32 0.00390625, %v206_v47  ;;  %v237_v21 = vadd.f32 %v236_v55, %v235_v19  ;;  %v125_v53 = vrot.slane %v124_v10, 2 }
  0xbb   :  { %v1289_v8 = vmul.f32 0.00390625, %v498_v0  ;;  %v273_v22 = vrot.slane %v272_v3, 2  ;;  %v65_v54 = vrot.slane %v64_v4, 1  ;;  %v153_v9 = vrot.slane %v152_v16, 4 }
  0xbc   :  { %v1291_v24 = vmul.f32 0.00390625, %v529_v11  ;;  %v188_v26 = vsub.f32 %v186_v13, %v187_v5  ;;  %v218_v27 = vmul.f32 0.00390625, %v216_v14  ;;  %v1296_v29 = vmul.f32 %v1283_v17, %v1283_v17 }
  0xbd   :  { %v1298_v30 = vadd.f32 %v264_v18, %v263_v12  ;;  %v245_v19 = vrot.slane %v244_v63, 1  ;;  %v96_v32 = vadd.f32 %v95_v15, %v94_v60  ;;  %v219_v34 = vmul.f32 %v1287_v20, %v1287_v20 }
  0xbe   :  { %v1302_v35 = vmul.f32 0.00390625, %v237_v21  ;;  %v126_v36 = vadd.f32 %v125_v53, %v124_v10  ;;  %v470_v37 = vsel %vm52_vm0, %v336_v23, 0.0  ;;  %v1307_v38 = vmul.f32 %v1289_v8, %v1289_v8 }
  0xbf   :  { %v1309_v42 = vadd.f32 %v273_v22, %v272_v3  ;;  %v66_v43 = vadd.f32 %v65_v54, %v64_v4  ;;  %v154_v46 = vadd.f32 %v153_v9, %v152_v16  ;;  %v1313_v12 = vmul.f32 %v1291_v24, %v1291_v24 }
  0xc0   :  { %v189_v47 = vadd.f32 1e-05, %v188_v26  ;;  %v220_v50 = vsub.f32 %v218_v27, %v219_v34  ;;  %v471_v51 = vrot.slane %v470_v37, 4  ;;  %v246_v55 = vadd.f32 %v245_v19, %v244_v63  ;;  %v334_v63 = vpop.xlane.xlu0 %333 }
  0xc1   :  { %v97_v57 = vrot.slane %v96_v32, 1  ;;  %v500_v58 = vrot.slane %v336_v23, 2  ;;  %v1318_v60 = vmul.f32 %v1302_v35, %v1302_v35  ;;  %v127_v0 = vrot.slane %v126_v36, 1 }
  0xc2   :  { %v472_v3 = vadd.f32 %v471_v51, %v470_v37  ;;  %v530_v4 = vrot.slane %v336_v23, 4  ;;  %v275_v10 = vrot.slane %v1309_v42, 1  ;;  %v68_v11 = vmul.f32 0.00390625, %v66_v43 }
  0xc3   :  { %v155_v13 = vrot.slane %v154_v46, 2  ;;  %v502_v14 = vsel %vm52_vm0, %v500_v58, 0.0  ;;  %1075 = vrsqrt.f32 %v189_v47  ;;  %v221_v16 = vadd.f32 1e-05, %v220_v50 }
  0xc4   :  { %v473_v18 = vrot.slane %v472_v3, 2  ;;  %v503_v15 = vrot.slane %v502_v14, 4  ;;  %v248_v5 = vmul.f32 0.00390625, %v246_v55  ;;  %v98_v21 = vadd.f32 %v97_v57, %v96_v32 }
  0xc5   :  { %v532_v53 = vsel %vm52_vm0, %v530_v4, 0.0  ;;  %v560_v22 = vrot.slane %v336_v23, 6  ;;  %v128_v54 = vadd.f32 %v127_v0, %v126_v36  ;;  %v70_v19 = vsub.f32 %v68_v11, %v1247_v44 }
  0xc6   :  { %v474_v9 = vadd.f32 %v473_v18, %v472_v3  ;;  %v504_v26 = vadd.f32 %v503_v15, %v502_v14  ;;  %v533_v27 = vrot.slane %v532_v53, 4  ;;  %v1324_v34 = vadd.f32 %v155_v13, %v154_v46 }
  0xc7   :  { %v352_v37 = vsel %vm52_vm0, %v334_v63, 0.0  ;;  %v382_v43 = vrot.slane %v334_v63, 2  ;;  %v562_v55 = vsel %vm52_vm0, %v560_v22, 0.0  ;;  %v412_v23 = vrot.slane %v334_v63, 4 }
  0xc8   :  { %v475_v47 = vrot.slane %v474_v9, 1  ;;  %v505_v50 = vrot.slane %v504_v26, 2  ;;  %v534_v51 = vadd.f32 %v533_v27, %v532_v53  ;;  %v353_v32 = vrot.slane %v352_v37, 4 }
  0xc9   :  { %v384_v57 = vsel %vm52_vm0, %v382_v43, 0.0  ;;  %v442_v36 = vrot.slane %v334_v63, 6  ;;  %v100_v58 = vmul.f32 0.00390625, %v98_v21  ;;  %v130_v0 = vmul.f32 0.00390625, %v128_v54 }
  0xca   :  { %v506_v3 = vadd.f32 %v505_v50, %v504_v26  ;;  %v535_v4 = vrot.slane %v534_v51, 2  ;;  %v354_v44 = vadd.f32 %v353_v32, %v352_v37  ;;  %v385_v46 = vrot.slane %v384_v57, 4 }
  0xcb   :  { %v414_v11 = vsel %vm52_vm0, %v412_v23, 0.0  ;;  %v444_v13 = vsel %vm52_vm0, %v442_v36, 0.0  ;;  %v476_v14 = vadd.f32 %v475_v47, %v474_v9  ;;  %v563_v53 = vrot.slane %v562_v55, 4 }
  0xcc   :  { %v507_v18 = vrot.slane %v506_v3, 1  ;;  %v536_v15 = vadd.f32 %v535_v4, %v534_v51  ;;  %v355_v22 = vrot.slane %v354_v44, 2  ;;  %v386_v27 = vadd.f32 %v385_v46, %v384_v57 }
  0xcd   :  { %v415_v31 = vrot.slane %v414_v11, 4  ;;  %v445_v43 = vrot.slane %v444_v13, 4  ;;  %v1331_v49 = vpop.eup %1075  ;;  %v250_v63 = vsub.f32 %v248_v5, %v1318_v60  ;;  %v102_v21 = vsub.f32 %v100_v58, %v1266_v62 }
  0xce   :  { %v508_v54 = vadd.f32 %v507_v18, %v506_v3  ;;  %v537_v26 = vrot.slane %v536_v15, 1  ;;  %v356_v37 = vadd.f32 %v355_v22, %v354_v44  ;;  %v387_v50 = vrot.slane %v386_v27, 2 }
  0xcf   :  { %v416_v32 = vadd.f32 %v415_v31, %v414_v11  ;;  %v446_v23 = vadd.f32 %v445_v43, %v444_v13  ;;  %v132_v9 = vsub.f32 %v130_v0, %v1270_v1  ;;  %v478_v47 = vmul.f32 0.00390625, %v476_v14 }
  0xd0   :  { %v538_v51 = vadd.f32 %v537_v26, %v536_v15  ;;  %v564_v36 = vadd.f32 %v563_v53, %v562_v55  ;;  %v510_v57 = vmul.f32 0.00390625, %v508_v54  ;;  %v357_v4 = vrot.slane %v356_v37, 1 }
  0xd1   :  { %v388_v46 = vadd.f32 %v387_v50, %v386_v27  ;;  %v417_v52 = vrot.slane %v416_v32, 2  ;;  %1077 = vrsqrt.f32 %v221_v16  ;;  %v71_v6 = vadd.f32 1e-05, %v70_v19 }
  0xd2   :  { %v103_v60 = vadd.f32 1e-05, %v102_v21  ;;  %v447_v5 = vrot.slane %v446_v23, 2  ;;  %v540_v62 = vmul.f32 0.00390625, %v538_v51  ;;  %v358_v58 = vadd.f32 %v357_v4, %v356_v37 }
  0xd3   :  { %v389_v3 = vrot.slane %v388_v46, 1  ;;  %v418_v44 = vadd.f32 %v417_v52, %v416_v32  ;;  %v251_v18 = vadd.f32 1e-05, %v250_v63  ;;  %v133_v31 = vadd.f32 1e-05, %v132_v9 }
  0xd4   :  { %v480_v11 = vsub.f32 %v478_v47, %v1296_v29  ;;  %v565_v1 = vrot.slane %v564_v36, 2  ;;  %v512_v0 = vsub.f32 %v510_v57, %v1307_v38  ;;  %v360_v55 = vmul.f32 0.00390625, %v358_v58 }
  0xd5   :  { %v390_v13 = vadd.f32 %v389_v3, %v388_v46  ;;  %v419_v14 = vrot.slane %v418_v44, 1  ;;  %v276_v16 = vadd.f32 %v275_v10, %v1309_v42  ;;  %1079 = vrsqrt.f32 %v103_v60  ;;  %v46_v3 = vld [vmem:[%s1696_s3] sm:$0xff] }
  0xd6   :  { %v157_v19 = vrot.slane %v1324_v34, 1  ;;  %v448_v15 = vadd.f32 %v447_v5, %v446_v23  ;;  %1081 = vrsqrt.f32 %v71_v6  ;;  %v542_v52 = vsub.f32 %v540_v62, %v1313_v12 }
  0xd7   :  { %v392_v53 = vmul.f32 0.00390625, %v390_v13  ;;  %v420_v22 = vadd.f32 %v419_v14, %v418_v44  ;;  %1083 = vrsqrt.f32 %v251_v18  ;;  %v481_v29 = vadd.f32 1e-05, %v480_v11 }
  0xd8   :  { %v566_v27 = vadd.f32 %v565_v1, %v564_v36  ;;  %v362_v38 = vsub.f32 %v360_v55, %v1239_v39  ;;  %1085 = vrsqrt.f32 %v133_v31  ;;  %v513_v43 = vadd.f32 1e-05, %v512_v0  ;;  %v1384_v0 = vld [vmem:[%s1694_s1] sm:$0xff] }
  0xd9   :  { %v394_v63 = vsub.f32 %v392_v53, %v1258_v56  ;;  %v422_v21 = vmul.f32 0.00390625, %v420_v22  ;;  %v1701_v42 = vrot.slane %v1272_v2, 2  ;;  %v278_v54 = vmul.f32 0.00390625, %v276_v16  ;;  %v941_v22 = vld [vmem:[%s1696_s3 + $0x10] sm:$0xff] }
  0xda   :  { %v449_v6 = vrot.slane %v448_v15, 1  ;;  %v1702_v12 = vrot.slane %v1298_v30, 1  ;;  %v158_v37 = vadd.f32 %v157_v19, %v1324_v34  ;;  %v543_v50 = vadd.f32 1e-05, %v542_v52 }
  0xdb   :  { %v557_v10 = vadd.f32 %v1701_v42, %v1272_v2  ;;  %v395_v32 = vadd.f32 1e-05, %v394_v63  ;;  %v424_v39 = vsub.f32 %v422_v21, %v1262_v61  ;;  %v1078_v23 = vpop.eup %1077  ;;  %1087 = vrsqrt.f32 %v481_v29  ;;  %v47_v2 = vld [vmem:[%s1696_s3 + $0x8] sm:$0xff]  ;;  %v942_v42 = vld [vmem:[%s1696_s3 + $0x18] sm:$0xff] }
  0xdc   :  { %v267_v26 = vadd.f32 %v1702_v12, %v1298_v30  ;;  %v567_v56 = vrot.slane %v566_v27, 1  ;;  %v363_v9 = vadd.f32 1e-05, %v362_v38  ;;  %1089 = vrsqrt.f32 %v513_v43  ;;  %v1364_v61 = vld [vmem:[%s1694_s1 + $0x8] sm:$0xff] }
  0xdd   :  { %v425_v51 = vadd.f32 1e-05, %v424_v39  ;;  %v1703_v30 = vrot.slane %v1234_v33, 1  ;;  %v558_v36 = vrot.slane %v557_v10, 1  ;;  %1091 = vrsqrt.f32 %v395_v32 }
  0xde   :  { %v1356_v47 = vmul.f32 0.00390625, %v267_v26  ;;  %v450_v57 = vadd.f32 %v449_v6, %v448_v15  ;;  %v160_v46 = vmul.f32 0.00390625, %v158_v37  ;;  %1093 = vrsqrt.f32 %v543_v50 }
  0xdf   :  { %v149_v34 = vadd.f32 %v1703_v30, %v1234_v33  ;;  %v1368_v60 = vadd.f32 1.0, %v47_v2  ;;  %v1080_v62 = vpop.eup %1079  ;;  %v568_v58 = vadd.f32 %v567_v56, %v566_v27  ;;  %1095 = vrsqrt.f32 %v363_v9 }
  0xe0   :  { %v279_v4 = vmul.f32 %v1356_v47, %v1356_v47  ;;  %v1704_v44 = vrot.slane %v1222_v59, 1  ;;  %v1082_v31 = vpop.eup %1081  ;;  %1097 = vrsqrt.f32 %v425_v51  ;;  %v191_v11 = vmul.f32 %v1331_v49, %v1364_v61 }
  0xe1   :  { %v1370_v5 = vmul.f32 0.00390625, %v149_v34  ;;  %v223_v1 = vmul.f32 %v1078_v23, %v1364_v61  ;;  %v1084_v13 = vpop.eup %1083  ;;  %v452_v14 = vmul.f32 0.00390625, %v450_v57  ;;  %v1390_v52 = vadd.f32 1.0, %v46_v3 }
  0xe2   :  { %v280_v33 = vsub.f32 %v278_v54, %v279_v4  ;;  %v441_v18 = vadd.f32 %v1704_v44, %v1222_v59  ;;  %v559_v59 = vadd.f32 %v558_v36, %v557_v10  ;;  %v1086_v15 = vpop.eup %1085  ;;  %v105_v49 = vmul.f32 %v1080_v62, %v1384_v0 }
  0xe3   :  { %v161_v55 = vmul.f32 %v1370_v5, %v1370_v5  ;;  %v570_v29 = vmul.f32 0.00390625, %v568_v58  ;;  %v73_v27 = vmul.f32 %v1082_v31, %v1384_v0  ;;  %v226_v43 = vmul.f32 %v223_v1, %v1368_v60 }
  0xe4   :  { %v281_v16 = vadd.f32 1e-05, %v280_v33  ;;  %v1388_v19 = vmul.f32 0.00390625, %v441_v18  ;;  %v253_v63 = vmul.f32 %v1084_v13, %v1364_v61  ;;  %v1404_v10 = vmul.f32 0.00390625, %v559_v59 }
  0xe5   :  { %v162_v53 = vsub.f32 %v160_v46, %v161_v55  ;;  %v1088_v54 = vpop.eup %1087  ;;  %v194_v6 = vmul.f32 %v191_v11, %v1368_v60  ;;  %v135_v12 = vmul.f32 %v1086_v15, %v1384_v0  ;;  %v1408_v26 = vadd.f32 1.0, %v941_v22  ;;  %v1426_v46 = vld [vmem:[%s1695_s2] sm:$0xff] }
  0xe6   :  { %1099 = vrsqrt.f32 %v281_v16  ;;  %v453_v38 = vmul.f32 %v1388_v19, %v1388_v19  ;;  %v1090_v50 = vpop.eup %1089  ;;  %v106_v32 = vmul.f32 %v105_v49, %v1249_v45  ;;  %v108_v39 = vmul.f32 %v105_v49, %v1390_v52 }
  0xe7   :  { %v163_v21 = vadd.f32 1e-05, %v162_v53  ;;  %v571_v23 = vmul.f32 %v1404_v10, %v1404_v10  ;;  %v1092_v56 = vpop.eup %1091  ;;  %v1415_v9 = vmul.f32 %v223_v1, %v1287_v20  ;;  %v74_v2 = vmul.f32 %v73_v27, %v1230_v25 }
  0xe8   :  { %v454_v37 = vsub.f32 %v452_v14, %v453_v38  ;;  %v1418_v30 = vadd.f32 1.0, %v942_v42  ;;  %v1094_v34 = vpop.eup %1093  ;;  %v256_v36 = vmul.f32 %v253_v63, %v1368_v60  ;;  %v294_v45 = vsel %vm52_vm0, %v194_v6, %v226_v43 }
  0xe9   :  { %1101 = vrsqrt.f32 %v163_v21  ;;  %v76_v57 = vmul.f32 %v73_v27, %v1390_v52  ;;  %v572_v4 = vsub.f32 %v570_v29, %v571_v23  ;;  %v1096_v20 = vpop.eup %1095  ;;  %v138_v62 = vmul.f32 %v135_v12, %v1390_v52  ;;  %v1452_v29 = vld [vmem:[%s1695_s2 + $0x8] sm:$0xff]  ;;  %v50_v23 = vld [vmem:[%s1697_s4] sm:$0xff] }
  0xea   :  { %v455_v51 = vadd.f32 1e-05, %v454_v37  ;;  %v483_v25 = vmul.f32 %v1088_v54, %v1364_v61  ;;  %v515_v58 = vmul.f32 %v1090_v50, %v1364_v61  ;;  %v1098_v33 = vpop.eup %1097  ;;  %v397_v44 = vmul.f32 %v1092_v56, %v1384_v0 }
  0xeb   :  { %v289_v3 = vsel %vm52_vm0, %v76_v57, %v108_v39  ;;  %v573_v18 = vadd.f32 1e-05, %v572_v4  ;;  %v107_v31 = vsub.f32 %v1426_v46, %v106_v32  ;;  %v1435_v1 = vmul.f32 %v253_v63, %v1302_v35 }
  0xec   :  { %1103 = vrsqrt.f32 %v455_v51  ;;  %v136_v55 = vmul.f32 %v135_v12, %v1252_v48  ;;  %v545_v13 = vmul.f32 %v1094_v34, %v1364_v61  ;;  %v75_v14 = vsub.f32 %v1426_v46, %v74_v2 }
  0xed   :  { %v295_v16 = vsel %vm290_vm1, %v294_v45, %v256_v36  ;;  %v192_v59 = vmul.f32 %v191_v11, %v1278_v28  ;;  %v365_v15 = vmul.f32 %v1096_v20, %v1384_v0  ;;  %1105 = vrsqrt.f32 %v573_v18 }
  0xee   :  { %v291_v53 = vsel %vm290_vm1, %v289_v3, %v138_v62  ;;  %v427_v22 = vmul.f32 %v1098_v33, %v1384_v0  ;;  %v1446_v35 = vmul.f32 %v483_v25, %v1283_v17  ;;  %v518_v48 = vmul.f32 %v515_v58, %v1418_v30 }
  0xef   :  { %v400_v11 = vmul.f32 %v397_v44, %v1408_v26  ;;  %v486_v27 = vmul.f32 %v483_v25, %v1418_v30  ;;  %v109_v38 = vmul.f32 %v107_v31, %v1390_v52  ;;  %v1459_v43 = vmul.f32 %v515_v58, %v1289_v8  ;;  %v51_v31 = vld [vmem:[%s1697_s4 + $0x8] sm:$0xff] }
  0xf0   :  { %v1100_v49 = vpop.eup %1099  ;;  %v548_v17 = vmul.f32 %v545_v13, %v1418_v30  ;;  %v77_v63 = vmul.f32 %v75_v14, %v1390_v52  ;;  %v137_v21 = vsub.f32 %v1426_v46, %v136_v55  ;;  %v368_v6 = vmul.f32 %v365_v15, %v1408_v26 }
  0xf1   :  { %v283_v28 = vmul.f32 %v1100_v49, %v1364_v61  ;;  %v193_v12 = vsub.f32 %v1452_v29, %v192_v59  ;;  %v225_v37 = vsub.f32 %v1452_v29, %v1415_v9  ;;  %v398_v8 = vmul.f32 %v397_v44, %v1241_v40 }
  0xf2   :  { %v430_v32 = vmul.f32 %v427_v22, %v1408_v26  ;;  %v584_v39 = vsel %vm52_vm0, %v486_v27, %v518_v48  ;;  %v581_v2 = vsel %vm52_vm0, %v368_v6, %v400_v11  ;;  %v366_v51 = vmul.f32 %v365_v15, %v1226_v7 }
  0xf3   :  { %v1102_v42 = vpop.eup %1101  ;;  %v286_v54 = vmul.f32 %v283_v28, %v1368_v60  ;;  %v110_v34 = vadd.f32 %v109_v38, %v50_v23  ;;  %v428_v45 = vmul.f32 %v427_v22, %v1243_v41  ;;  %v139_v57 = vmul.f32 %v137_v21, %v1390_v52 }
  0xf4   :  { %v165_v50 = vmul.f32 %v1102_v42, %v1384_v0  ;;  %v195_v20 = vmul.f32 %v193_v12, %v1368_v60  ;;  %v227_v62 = vmul.f32 %v225_v37, %v1368_v60  ;;  %v255_v7 = vsub.f32 %v1452_v29, %v1435_v1 }
  0xf5   :  { %v296_v56 = vsel %vm292_vm2, %v295_v16, %v286_v54  ;;  %v284_v25 = vmul.f32 %v283_v28, %v1356_v47  ;;  %v399_v33 = vsub.f32 %v1426_v46, %v398_v8  ;;  %v78_v44 = vadd.f32 %v77_v63, %v50_v23 }
  0xf6   :  { %v1104_v9 = vpop.eup %1103  ;;  %310 = vperm.xlu1 %1012, %v296_v56   ;;  %v166_v36 = vmul.f32 %v165_v50, %v1370_v5  ;;  %v168_v40 = vmul.f32 %v165_v50, %v1390_v52  ;;  %v582_v5 = vsel %vm290_vm1, %v581_v2, %v430_v32  ;;  %v585_v1 = vsel %vm290_vm1, %v584_v39, %v548_v17 }
  0xf7   :  { %v457_v4 = vmul.f32 %v1104_v9, %v1384_v0  ;;  %v1106_v41 = vpop.eup %1105  ;;  %v546_v0 = vmul.f32 %v545_v13, %v1291_v24  ;;  %v140_v55 = vadd.f32 %v139_v57, %v50_v23  ;;  %v367_v14 = vsub.f32 %v1426_v46, %v366_v51 }
  0xf8   :  { %v293_v58 = vsel %vm292_vm2, %v291_v53, %v168_v40  ;;  %v167_v18 = vsub.f32 %v1426_v46, %v166_v36  ;;  %v575_v47 = vmul.f32 %v1106_v41, %v1364_v61  ;;  %v297_v59 = vsel %vm52_vm0, %v78_v44, %v110_v34 }
  0xf9   :  { %305 = vperm.xlu0 %1011, %v293_v58   ;;  %v460_v3 = vmul.f32 %v457_v4, %v1408_v26  ;;  %v228_v15 = vadd.f32 %v227_v62, %v51_v31  ;;  %v257_v24 = vmul.f32 %v255_v7, %v1368_v60  ;;  %v196_v13 = vadd.f32 %v195_v20, %v51_v31 }
  0xfa   :  { %v285_v49 = vsub.f32 %v1452_v29, %v284_v25  ;;  %v401_v53 = vmul.f32 %v399_v33, %v1408_v26  ;;  %v429_v61 = vsub.f32 %v1426_v46, %v428_v45  ;;  %v458_v22 = vmul.f32 %v457_v4, %v1388_v19  ;;  %v943_v19 = vld [vmem:[%s1697_s4 + $0x10] sm:$0xff] }
  0xfb   :  { %v583_v16 = vsel %vm292_vm2, %v582_v5, %v460_v3  ;;  %v578_v48 = vmul.f32 %v575_v47, %v1418_v30  ;;  %v169_v28 = vmul.f32 %v167_v18, %v1390_v52  ;;  %v517_v11 = vsub.f32 %v1452_v29, %v1459_v43  ;;  %v1123_v3 = vld [vmem:[%s1693_s0] sm:$0xff]  ;;  %v1124_v18 = vld [vmem:[%s1693_s0 + $0x10] sm:$0xff] }
  0xfc   :  { %595 = vperm.xlu1 %1012, %v583_v16   ;;  %v298_v27 = vsel %vm290_vm1, %v297_v59, %v140_v55  ;;  %v369_v38 = vmul.f32 %v367_v14, %v1408_v26  ;;  %v258_v63 = vadd.f32 %v257_v24, %v51_v31  ;;  %v300_v21 = vsel %vm52_vm0, %v196_v13, %v228_v15  ;;  %v1125_v14 = vld [vmem:[%s1693_s0 + $0x8] sm:$0xff]  ;;  %v1126_v13 = vld [vmem:[%s1693_s0 + $0x18] sm:$0xff]  ;;  %s1152_s0 = smov 3  }
  0xfd   :  { %v586_v17 = vsel %vm292_vm2, %v585_v1, %v578_v48  ;;  %v485_v42 = vsub.f32 %v1452_v29, %v1446_v35  ;;  %v287_v52 = vmul.f32 %v285_v49, %v1368_v60  ;;  %v402_v43 = vadd.f32 %v943_v19, %v401_v53 }
  0xfe   :  { %v431_v54 = vmul.f32 %v429_v61, %v1408_v26  ;;  %v547_v6 = vsub.f32 %v1452_v29, %v546_v0  ;;  %v576_v12 = vmul.f32 %v575_v47, %v1404_v10  ;;  %v170_v37 = vadd.f32 %v169_v28, %v50_v23  ;;  %v944_v10 = vld [vmem:[%s1697_s4 + $0x18] sm:$0xff] }
  0xff   :  { %v459_v50 = vsub.f32 %v1426_v46, %v458_v22  ;;  %v519_v8 = vmul.f32 %v517_v11, %v1418_v30  ;;  %v370_v32 = vadd.f32 %v943_v19, %v369_v38  ;;  %v487_v35 = vmul.f32 %v485_v42, %v1418_v30 }
 0x100   :  { %600 = vperm.xlu1 %1012, %v586_v17   ;;  %v299_v39 = vsel %vm292_vm2, %v298_v27, %v170_v37  ;;  %v301_v60 = vsel %vm290_vm1, %v300_v21, %v258_v63  ;;  %v432_v56 = vadd.f32 %v943_v19, %v431_v54  ;;  %v549_v23 = vmul.f32 %v547_v6, %v1418_v30 }
 0x101   :  { %v587_v2 = vsel %vm52_vm0, %v370_v32, %v402_v43  ;;  %v288_v46 = vadd.f32 %v287_v52, %v51_v31  ;;  %v461_v51 = vmul.f32 %v459_v50, %v1408_v26  ;;  %v520_v34 = vadd.f32 %v944_v10, %v519_v8 }
 0x102   :  { %v577_v9 = vsub.f32 %v1452_v29, %v576_v12  ;;  %v488_v40 = vadd.f32 %v944_v10, %v487_v35  ;;  %v588_v45 = vsel %vm290_vm1, %v587_v2, %v432_v56  ;;  %v550_v57 = vadd.f32 %v944_v10, %v549_v23  ;;  %v830_v56 = vld [vmem:[%s1699_s6 + $0x10] sm:$0xff]  ;;  %v829_v2 = vld [vmem:[%s1699_s6 + $0x8] sm:$0xff] }
 0x103   :  { %v302_v36 = vsel %vm292_vm2, %v301_v60, %v288_v46  ;;  %v462_v4 = vadd.f32 %v943_v19, %v461_v51  ;;  %v828_v60 = vld [vmem:[%s1699_s6] sm:$0xff]  ;;  %v645_v23 = vlaneseq }
 0x104   :  { %317 = vperm.xlu1 %1012, %v299_v39   ;;  %v579_v20 = vmul.f32 %v577_v9, %v1418_v30  ;;  %v590_v62 = vsel %vm52_vm0, %v488_v40, %v520_v34 }
 0x105   :  { %v589_v7 = vsel %vm292_vm2, %v588_v45, %v462_v4  ;;  %v591_v26 = vsel %vm290_vm1, %v590_v62, %v550_v57  ;;  %v1572_v46 = vand.u32 127, %v645_v23 }
 0x106   :  { %v580_v25 = vadd.f32 %v944_v10, %v579_v20  ;;  %v831_v10 = vld [vmem:[%s1699_s6 + $0x18] sm:$0xff] }
 0x107   :  { %v647_v34 = vadd.s32 128, %v1572_v46  ;;  %vm680_vm3 = vcmp.lt.s32.totalorder %v1572_v46, 3  ;;  %vm685_vm5 = vcmp.ge.s32.totalorder %v1572_v46, 3  ;;  %vm705_vm6 = vcmp.lt.s32.totalorder %v1572_v46, 2 }
 0x108   :  { %322 = vperm.xlu1 %1012, %v302_v36   ;;  %v592_v29 = vsel %vm292_vm2, %v591_v26, %v580_v25  ;;  %vm1581_vm8 = vmpackc.low %vm685_vm5, %vm685_vm5  ;;  %vm710_vm10 = vcmp.ge.s32.totalorder %v1572_v46, 2  ;;  %vm730_vm11 = vcmp.lt.s32.totalorder %v1572_v46, 1  ;;  %vm735_vm15 = vcmp.ge.s32.totalorder %v1572_v46, 1 }
 0x109   :  { %v1575_v36 = vand.u32 127, %v647_v34  ;;  %vm1603_vm13 = vmpackc.low %vm710_vm10, %vm710_vm10  ;;  %vm757_vm1 = vcmp.lt.s32.totalorder %v1572_v46, 127 }
 0x10a   :  { %vm966_vm2 = vmpackc.low %vm735_vm15, %vm735_vm15 }
 0x10b   :  { %vm686_vm4 = vcmp.ge.s32.totalorder %v1575_v36, 3  ;;  %vm711_vm9 = vcmp.ge.s32.totalorder %v1575_v36, 2  ;;  %vm736_vm14 = vcmp.ge.s32.totalorder %v1575_v36, 1  ;;  %vm813_vm10 = vcmp.lt.s32.totalorder %v1575_v36, 125 }
 0x10c   :  { %607 = vperm.xlu1 %1012, %v589_v7   ;;  %vm951_vm7 = vmpackc.low %vm686_vm4, %vm686_vm4  ;;  %vm782_vm4 = vcmp.lt.s32.totalorder %v1572_v46, 126 }
 0x10d   :  { %vm957_vm12 = vmpackc.low %vm711_vm9, %vm711_vm9 }
 0x10e   :  { %vm963_vm0 = vmpackc.low %vm736_vm14, %vm736_vm14 }
 0x110   :  { %612 = vperm.xlu1 %1012, %v592_v29  }
 0x175   :  { %v311_v58 = vpop.permute.xlu1 %310 }
 0x176   :  { %v314_v31 = vmul.f32 %v1124_v18, %v311_v58 }
 0x178   :  { %v306_v33 = vpop.permute.xlu0 %305 }
 0x179   :  { %v313_v30 = vmul.f32 %v1123_v3, %v306_v33 }
 0x17b   :  { %v596_v5 = vpop.permute.xlu1 %595 }
 0x17c   :  { %v603_v16 = vmul.f32 %v1125_v14, %v596_v5 }
 0x17f   :  { %v601_v41 = vpop.permute.xlu1 %600 }
 0x180   :  { %v604_v49 = vmul.f32 %v1126_v13, %v601_v41 }
 0x183   :  { %v318_v0 = vpop.permute.xlu1 %317 }
 0x184   :  { %v325_v44 = vadd.f32 %v318_v0, %v313_v30 }
 0x186   :  { %v945_v47 = vmul.f32 -1.442695, %v325_v44 }
 0x187   :  { %v323_v1 = vpop.permute.xlu1 %322 }
 0x188   :  { %1107 = vpow2.f32 %v945_v47  ;;  %v326_v55 = vadd.f32 %v323_v1, %v314_v31 }
 0x18a   :  { %v947_v59 = vmul.f32 -1.442695, %v326_v55 }
 0x18b   :  { %v608_v15 = vpop.permute.xlu1 %607 }
 0x18c   :  { %1109 = vpow2.f32 %v947_v59  ;;  %v615_v24 = vadd.f32 %v608_v15, %v603_v16 }
 0x18e   :  { %v946_v53 = vmul.f32 -1.442695, %v615_v24 }
 0x18f   :  { %v613_v61 = vpop.permute.xlu1 %612 }
 0x190   :  { %1111 = vpow2.f32 %v946_v53  ;;  %v616_v22 = vadd.f32 %v613_v61, %v604_v49 }
 0x192   :  { %v1108_v48 = vpop.eup %1107  ;;  %v948_v28 = vmul.f32 -1.442695, %v616_v22 }
 0x193   :  { %v629_v11 = vadd.f32 1.0, %v1108_v48 }
 0x194   :  { %1113 = vpow2.f32 %v948_v28 }
 0x195   :  { %1115 = vrcp.f32 %v629_v11 }
 0x196   :  { %v1110_v27 = vpop.eup %1109 }
 0x197   :  { %v631_v38 = vadd.f32 1.0, %v1110_v27 }
 0x199   :  { %1117 = vrcp.f32 %v631_v38 }
 0x19a   :  { %v1112_v17 = vpop.eup %1111 }
 0x19b   :  { %v630_v63 = vadd.f32 1.0, %v1112_v17 }
 0x19d   :  { %1119 = vrcp.f32 %v630_v63 }
 0x19e   :  { %v1114_v21 = vpop.eup %1113 }
 0x19f   :  { %v632_v19 = vadd.f32 1.0, %v1114_v21  ;;  %v1116_v42 = vpop.eup %1115 }
 0x1a0   :  { %v641_v43 = vmul.f32 %v1116_v42, %v325_v44 }
 0x1a1   :  { %1121 = vrcp.f32 %v632_v19 }
 0x1a3   :  { %v1118_v52 = vpop.eup %1117 }
 0x1a4   :  { %v643_v54 = vmul.f32 %v1118_v52, %v326_v55 }
 0x1a6   :  { %v1013_v6 = vpack.i.bf16 %v643_v54, %v641_v43  ;;  %v1556_v12 = vpack.c.bf16 %v643_v54, %v641_v43 }
 0x1a7   :  { %v1120_v37 = vpop.eup %1119 }
 0x1a8   :  { %1014 = vrot.lane.b32.xlu1 %v1013_v6, %s1152_s0  ;;  %v642_v8 = vmul.f32 %v1120_v37, %v615_v24 }
 0x1ab   :  { %v1122_v50 = vpop.eup %1121 }
 0x1ac   :  { %v644_v32 = vmul.f32 %v1122_v50, %v616_v22  ;;  %1024 = vrot.lane.b32.xlu1 %v1013_v6, %s1153_s14 }
 0x1ae   :  { %v1018_v39 = vpack.i.bf16 %v644_v32, %v642_v8  ;;  %v1558_v35 = vpack.c.bf16 %v644_v32, %v642_v8 }
 0x1b0   :  { %1019 = vrot.lane.b32.xlu0 %v1018_v39, %s1152_s0  ;;  %1034 = vrot.lane.b32.xlu1 %v1013_v6, %s1154_s15 }
 0x1b4   :  { %1029 = vrot.lane.b32.xlu0 %v1018_v39, %s1153_s14  ;;  %1044 = vrot.lane.b32.xlu1 %v1013_v6, %s1155_s16 }
 0x1b8   :  { %1039 = vrot.lane.b32.xlu0 %v1018_v39, %s1154_s15  ;;  %1054 = vrot.lane.b32.xlu1 %v1013_v6, %s1156_s17 }
 0x1bc   :  { %1049 = vrot.lane.b32.xlu0 %v1018_v39, %s1155_s16  ;;  %1064 = vrot.lane.b32.xlu1 %v1013_v6, %s1157_s18 }
 0x1c0   :  { %1059 = vrot.lane.b32.xlu0 %v1018_v39, %s1156_s17  ;;  %834 = vperm.xlu1 %1012, %v828_v60  }
 0x1c4   :  { %1069 = vrot.lane.b32.xlu0 %v1018_v39, %s1157_s18  ;;  %844 = vperm.xlu1 %1012, %v830_v56  }
 0x1c8   :  { %839 = vperm.xlu0 %1011, %v829_v2  }
 0x1cc   :  { %849 = vperm.xlu0 %1011, %v831_v10  }
 0x21a   :  { %v1015_v51 = vpop.permute.xlu1 %1014 }
 0x21b   :  { %v1017_v57 = vunpack.i.h.bf16 %v1015_v51  ;;  %v1016_v4 = vunpack.i.l.bf16 %v1015_v51 }
 0x21e   :  { %v1025_v9 = vpop.permute.xlu1 %1024 }
 0x21f   :  { %v1027_v3 = vunpack.i.h.bf16 %v1025_v9  ;;  %v1026_v30 = vunpack.i.l.bf16 %v1025_v9 }
 0x222   :  { %v1035_v40 = vpop.permute.xlu1 %1034  ;;  %v1020_v45 = vpop.permute.xlu0 %1019 }
 0x223   :  { %v1022_v20 = vunpack.i.h.bf16 %v1020_v45  ;;  %v1021_v62 = vunpack.i.l.bf16 %v1020_v45  ;;  %v1037_v24 = vunpack.i.h.bf16 %v1035_v40  ;;  %v1036_v13 = vunpack.i.l.bf16 %v1035_v40 }
 0x225   :  { %v681_v7 = vsel %vm680_vm3, %v1016_v4, %v1021_v62  ;;  %v682_v26 = vsel %vm680_vm3, %v1017_v57, %v1022_v20  ;;  %v683_v25 = vsel %vm680_vm3, %v1021_v62, %v1016_v4  ;;  %v684_v29 = vsel %vm680_vm3, %v1022_v20, %v1017_v57 }
 0x226   :  { %v1030_v58 = vpop.permute.xlu0 %1029  ;;  %v952_v5 = vpack.c.bf16 %v682_v26, %v681_v7  ;;  %v955_v41 = vpack.c.bf16 %v684_v29, %v683_v25  ;;  %v1045_v0 = vpop.permute.xlu1 %1044  ;;  %vm763_vm3 = vcmp.lt.s32.totalorder %v1575_v36, 127 }
 0x227   :  { %v1032_v44 = vunpack.i.h.bf16 %v1030_v58  ;;  %v1031_v18 = vunpack.i.l.bf16 %v1030_v58  ;;  %v1047_v63 = vunpack.i.h.bf16 %v1045_v0  ;;  %v1046_v21 = vunpack.i.l.bf16 %v1045_v0  ;;  %vm1633_vm5 = vmpackc.low %vm763_vm3, %vm763_vm3  ;;  %v1073_v58 = vld [vmem:[%s1698_s5] sm:$0xff]  }
 0x228   :  { %953 = vmatprep.subr.msk.bf16.mxu0 %vm951_vm7, %v952_v5  ;;  %987 = vmatprep.subr.msk.bf16.mxu1 %vm951_vm7, %v952_v5  ;;  %vm807_vm7 = vcmp.lt.s32.totalorder %v1572_v46, 125  ;;  %v1074_v5 = vld [vmem:[%s1698_s5 + $0x8] sm:$0xff]   ;;  %s1127_s5 = scalar_lea.vmem %s931_s28, 1024 }
 0x229   :  { %v707_v31 = vsel %vm705_vm6, %v1027_v3, %v1032_v44  ;;  %v709_v47 = vsel %vm705_vm6, %v1032_v44, %v1027_v3  ;;  %v706_v1 = vsel %vm705_vm6, %v1026_v30, %v1031_v18  ;;  %v708_v55 = vsel %vm705_vm6, %v1031_v18, %v1026_v30  ;;  %956 = vmatpush1.bf16.msk.msra.mxu0 %vm1581_vm8, %v955_v41  ;;  %p1128_p0 = scmp.ne.s32.totalorder %s931_s28, %s1127_s5  ;;  %p1133_p2 = scmp.lt.s32.totalorder %s1127_s5, %s1127_s5 }
 0x22a   :  { %v958_v14 = vpack.c.bf16 %v707_v31, %v706_v1  ;;  %v961_v16 = vpack.c.bf16 %v709_v47, %v708_v55  ;;  %994 = vmatpush1.bf16.msk.msra.mxu1 %vm1581_vm8, %v955_v41  ;;  %v1040_v59 = vpop.permute.xlu0 %1039  ;;  %v1055_v61 = vpop.permute.xlu1 %1054  ;;  %vm788_vm6 = vcmp.lt.s32.totalorder %v1575_v36, 126  ;;  %vm972_vm8 = vmpackc.low %vm757_vm1, %vm757_vm1 }
 0x22b   :  { %v1042_v49 = vunpack.i.h.bf16 %v1040_v59  ;;  %v1041_v53 = vunpack.i.l.bf16 %v1040_v59  ;;  %v1057_v6 = vunpack.i.h.bf16 %v1055_v61  ;;  %v1056_v37 = vunpack.i.l.bf16 %v1055_v61  ;;  %vm975_vm9 = vmpackc.low %vm788_vm6, %vm788_vm6  ;;  %p1134_p3 = por %p1133_p2, %p1132_p1 }
 0x22c   :  { %959 = vmatprep.subr.msk.bf16.mxu0 %vm957_vm12, %v958_v14  ;;  %988 = vmatprep.subr.msk.bf16.mxu1 %vm957_vm12, %v958_v14  ;;  %vm981_vm12 = vmpackc.low %vm813_vm10, %vm813_vm10 }
 0x22d   :  { %v732_v22 = vsel %vm730_vm11, %v1037_v24, %v1042_v49  ;;  %v734_v48 = vsel %vm730_vm11, %v1042_v49, %v1037_v24  ;;  %v731_v28 = vsel %vm730_vm11, %v1036_v13, %v1041_v53  ;;  %v733_v11 = vsel %vm730_vm11, %v1041_v53, %v1036_v13  ;;  %962 = vmatpush1.bf16.msk.msra.mxu0 %vm1603_vm13, %v961_v16  ;;  %vm978_vm11 = vmpackc.low %vm782_vm4, %vm782_vm4  ;;  %p1135_p4 = pnand %p1134_p3, %p1128_p0 }
 0x22e   :  { %v964_v27 = vpack.c.bf16 %v732_v22, %v731_v28  ;;  %v967_v38 = vpack.c.bf16 %v734_v48, %v733_v11  ;;  %995 = vmatpush1.bf16.msk.msra.mxu1 %vm1603_vm13, %v961_v16  ;;  %v1050_v17 = vpop.permute.xlu0 %1049  ;;  %v1065_v50 = vpop.permute.xlu1 %1064  ;;  %vm984_vm13 = vmpackc.low %vm807_vm7, %vm807_vm7 }
 0x22f   :  { %v1052_v19 = vunpack.i.h.bf16 %v1050_v17  ;;  %v1051_v42 = vunpack.i.l.bf16 %v1050_v17  ;;  %v1066_v34 = vunpack.i.l.bf16 %v1065_v50 }
 0x230   :  { %965 = vmatprep.subr.msk.bf16.mxu0 %vm963_vm0, %v964_v27  ;;  %989 = vmatprep.subr.msk.bf16.mxu1 %vm963_vm0, %v964_v27 }
 0x231   :  { %v761_v52 = vsel %vm757_vm1, %v1052_v19, %v1047_v63  ;;  %v760_v43 = vsel %vm757_vm1, %v1051_v42, %v1046_v21  ;;  %968 = vmatpush1.bf16.msk.msra.mxu0 %vm966_vm2, %v967_v38  ;;  %v759_v60 = vsel %vm757_vm1, %v1047_v63, %v1052_v19  ;;  %v758_v56 = vsel %vm757_vm1, %v1046_v21, %v1051_v42 }
 0x232   :  { %996 = vmatpush1.bf16.msk.msra.mxu1 %vm966_vm2, %v967_v38  ;;  %v1060_v54 = vpop.permute.xlu0 %1059  ;;  %870 = vmatprep.subr.bf16.mxu0 %v1558_v35  ;;  %v970_v2 = vpack.c.bf16 %v761_v52, %v760_v43  ;;  %v973_v9 = vpack.c.bf16 %v759_v60, %v758_v56 }
 0x233   :  { %v1062_v8 = vunpack.i.h.bf16 %v1060_v54  ;;  %v1061_v32 = vunpack.i.l.bf16 %v1060_v54  ;;  %990 = vmatprep.subr.bf16.mxu1 %v1558_v35  ;;  %v1067_v35 = vunpack.i.h.bf16 %v1065_v50 }
 0x235   :  { %v786_v10 = vsel %vm782_vm4, %v1062_v8, %v1057_v6  ;;  %v785_v23 = vsel %vm782_vm4, %v1061_v32, %v1056_v37  ;;  %871 = vmatpush1.bf16.msra.mxu0 %v1556_v12  ;;  %v783_v57 = vsel %vm782_vm4, %v1056_v37, %v1061_v32 }
 0x236   :  { %997 = vmatpush1.bf16.msra.mxu1 %v1556_v12  ;;  %v1070_v51 = vpop.permute.xlu0 %1069  ;;  %971 = vmatprep.subr.msk.bf16.mxu0 %vm1633_vm5, %v970_v2  ;;  %v784_v12 = vsel %vm782_vm4, %v1057_v6, %v1062_v8  ;;  %v976_v4 = vpack.c.bf16 %v786_v10, %v785_v23 }
 0x237   :  { %v1072_v40 = vunpack.i.h.bf16 %v1070_v51  ;;  %v1071_v45 = vunpack.i.l.bf16 %v1070_v51  ;;  %991 = vmatprep.subr.msk.bf16.mxu1 %vm1633_vm5, %v970_v2  ;;  %v979_v7 = vpack.c.bf16 %v784_v12, %v783_v57 }
 0x239   :  { %v811_v20 = vsel %vm807_vm7, %v1072_v40, %v1067_v35  ;;  %v810_v62 = vsel %vm807_vm7, %v1071_v45, %v1066_v34  ;;  %974 = vmatpush1.bf16.msk.msra.mxu0 %vm972_vm8, %v973_v9  ;;  %v809_v26 = vsel %vm807_vm7, %v1067_v35, %v1072_v40  ;;  %v808_v36 = vsel %vm807_vm7, %v1066_v34, %v1071_v45 }
 0x23a   :  { %998 = vmatpush1.bf16.msk.msra.mxu1 %vm972_vm8, %v973_v9  ;;  %977 = vmatprep.subr.msk.bf16.mxu0 %vm975_vm9, %v976_v4  ;;  %v982_v25 = vpack.c.bf16 %v811_v20, %v810_v62  ;;  %v985_v29 = vpack.c.bf16 %v809_v26, %v808_v36 }
 0x23b   :  { %992 = vmatprep.subr.msk.bf16.mxu1 %vm975_vm9, %v976_v4 }
 0x23d   :  { %980 = vmatpush1.bf16.msk.msra.mxu0 %vm978_vm11, %v979_v7 }
 0x23e   :  { %999 = vmatpush1.bf16.msk.msra.mxu1 %vm978_vm11, %v979_v7  ;;  %983 = vmatprep.subr.msk.bf16.mxu0 %vm981_vm12, %v982_v25 }
 0x23f   :  { %993 = vmatprep.subr.msk.bf16.mxu1 %vm981_vm12, %v982_v25  ;;  %v835_v33 = vpop.permute.xlu1 %834 }
 0x241   :  { %986 = vmatpush1.bf16.msk.msra.mxu0 %vm984_vm13, %v985_v29 }
 0x242   :  { %1000 = vmatpush1.bf16.msk.msra.mxu1 %vm984_vm13, %v985_v29 }
 0x243   :  { %v845_v3 = vpop.permute.xlu1 %844 }
 0x244   :  { %897 = vmatmul.mubr.bf16.vlgmr.msra.gmra.mrb[0].mxu0 %v1073_v58 }
 0x245   :  { %907 = vmatmul.mubr.bf16.vlgmr.msra.gmra.mrb[0].mxu1 %v1074_v5 }
 0x247   :  { %v840_v41 = vpop.permute.xlu0 %839 }
 0x24b   :  { %v850_v46 = vpop.permute.xlu0 %849 }
 0x317   :  { %v898_v30 = vpop.f32.mrb[0].mxu0 }
 0x318   :  { %v899_v0 = vadd.f32 %v898_v30, %v835_v33  ;;  %v908_v44 = vpop.f32.mrb[0].mxu1  ;;  %v900_v18 = vpop.f32.mrb[1].mxu0 }
 0x319   :  { %v909_v31 = vadd.f32 %v908_v44, %v845_v3  ;;  %v901_v47 = vadd.f32 %v900_v18, %v835_v33  ;;  %v910_v1 = vpop.f32.mrb[1].mxu1  ;;  %v902_v55 = vpop.f32.mrb[2].mxu0 }
 0x31a   :  { %917 = vst [vmem:[#allocation2] sm:$0xff] %v899_v0  ;;  %v911_v14 = vadd.f32 %v910_v1, %v845_v3  ;;  %v903_v16 = vadd.f32 %v902_v55, %v840_v41  ;;  %v912_v59 = vpop.f32.mrb[2].mxu1  ;;  %v904_v15 = vpop.f32.mrb[3].mxu0 }
 0x31b   :  { %921 = vst [vmem:[#allocation2 + $0x20] sm:$0xff] %v909_v31  ;;  %918 = vst [vmem:[#allocation2 + $0x8] sm:$0xff] %v901_v47  ;;  %v913_v24 = vadd.f32 %v912_v59, %v850_v46  ;;  %v905_v13 = vadd.f32 %v904_v15, %v840_v41  ;;  %v914_v49 = vpop.f32.mrb[3].mxu1 }
 0x31c   :  { %922 = vst [vmem:[#allocation2 + $0x28] sm:$0xff] %v911_v14  ;;  %919 = vst [vmem:[#allocation2 + $0x10] sm:$0xff] %v903_v16  ;;  %v915_v53 = vadd.f32 %v914_v49, %v850_v46 }
 0x31d   :  { %923 = vst [vmem:[#allocation2 + $0x30] sm:$0xff] %v913_v24  ;;  %920 = vst [vmem:[#allocation2 + $0x18] sm:$0xff] %v905_v13 }
 0x31e   :  { %924 = vst [vmem:[#allocation2 + $0x38] sm:$0xff] %v915_v53 }
 0x31f   :  { %1138 = shalt.err (!%p1135_p4)
}
 0x320   :  { %s1139_s30 = scalar_lea.hbm %s1700_s7, 1024 }
 0x321   :  { %p1140_p5 = scmp.ne.s32.totalorder %s1700_s7, %s1139_s30  ;;  %p1143_p6 = scmp.lt.u32.totalorder %s1139_s30, %s1700_s7 }
 0x323   :  { %p1145_p7 = pnand %p1143_p6, %p1140_p5 }
 0x325   :  { %1148 = shalt.err (!%p1145_p7)
}
 0x326   :  { %s1159_s12 = smov 256   ;;  %s1160_s13 = smov 16  }
 0x327   :  { %936 = dma.vmem_to_hbm [thread:$0]  %s931_s28, 1024, %s1700_s7, [#allocation3], %s1159_s12, %s1159_s12, %s1160_s13  }
 0x328   :  { %1149 = dma.done.wait [#allocation3], 1024  }
 0x329   :  { %1150 = vsyncadd [#allocation3], 4294966272 }
 0x32a   :  { %940 = vsyncpa [#allocation3], 1 }

</bundles_post_ra>
